<compile_context>
chip_gen: v7x
topology: tpu7x:2x2x1
jax: 0.10.0
libtpu: 0.0.40
codegen_flags: <defaults>
</compile_context>

<pallas_src>
import functools
import math

import jax
import jax.numpy as jnp
from jax import lax
from jax.experimental import pallas as pl
from jax.experimental.pallas import tpu as pltpu  # noqa: F401 (kept for v7x TODO)


# --------------------------------------------------------------------------- #
# Kernel
# --------------------------------------------------------------------------- #
def _src_att_layer_kernel(B, Tq, Tk, D, Dff, num_heads, eps,
                          x_ref, m_ref, bias_ref,
                          w32_ref, wide_ref, b32_ref,
                          out_ref):
    f32 = jnp.float32
    d_k = D // num_heads
    inv_sqrt_dk = f32(1.0 / math.sqrt(d_k))

    x = x_ref[...]      # (B*Tq, D)
    m = m_ref[...]      # (B*Tk, D)

    # ---- unpack parameter slabs (static, sublane-aligned row sections) -----
    wq   = w32_ref[0:D, :]                   # (D,   D)
    wkv  = w32_ref[D:3 * D, :]               # (2D,  D)  rows = [Wk ; Wv]
    wo_t = w32_ref[3 * D:4 * D, :]           # (D,   D)  = Wo.T
    w1   = w32_ref[4 * D:4 * D + Dff, :]     # (Dff, D)

    w2   = wide_ref[0:D, 0:Dff]              # (D, Dff)
    b1   = wide_ref[D:D + 1, 0:Dff]          # (1, Dff)
    bkv  = wide_ref[D + 1:D + 2, 0:2 * D]    # (1, 2D) = [bk | bv]

    ln1_a = b32_ref[0:1, :]
    ln1_b = b32_ref[1:2, :]
    bq    = b32_ref[2:3, :]
    bo    = b32_ref[3:4, :]
    ln2_a = b32_ref[4:5, :]
    ln2_b = b32_ref[5:6, :]
    b2    = b32_ref[6:7, :]

    def layer_norm(v, a, b):
        # Annotated-transformer LayerNorm: a*(v-mean)/(std+eps)+b, unbiased std.
        mean = jnp.mean(v, axis=-1, keepdims=True)
        var = jnp.sum((v - mean) * (v - mean), axis=-1, keepdims=True) \
            / f32(v.shape[-1] - 1)
        inv = pl.reciprocal(jnp.sqrt(var) + f32(eps), approx=True)   # EUP slot
        return a * (v - mean) * inv + b

    def contract_last(a, b):
        # a @ b.T without materializing a transpose (contract lane dims).
        return lax.dot_general(a, b, (((1,), (1,)), ((), ())),
                               preferred_element_type=jnp.float32)

    # ---- sublayer[0]: x + src_attn(LN(x), m, m, src_mask) ------------------
    n1 = layer_norm(x, ln1_a, ln1_b)
    q  = contract_last(n1, wq) + bq          # (B*Tq, D)   one wide matmul
    kv = contract_last(m, wkv) + bkv         # (B*Tk, 2D)  one wide matmul [K|V]

    outs = []
    for b in range(B):                       # static unroll, B=2
        qr = b * Tq
        kr = b * Tk
        bias_b = bias_ref[b:b + 1, :]        # (1, Tk) additive 0 / -1e9
        heads = []
        for h in range(num_heads):           # static unroll
            lo = h * d_k
            qh = q[qr:qr + Tq, lo:lo + d_k]            # (Tq, d_k) lane slice
            kh = kv[kr:kr + Tk, lo:lo + d_k]           # (Tk, d_k)
            vh = kv[kr:kr + Tk, D + lo:D + lo + d_k]   # (Tk, d_k)

            scores = contract_last(qh, kh) * inv_sqrt_dk + bias_b   # (Tq, Tk)
            mx = jnp.max(scores, axis=-1, keepdims=True)
            e = jnp.exp(scores - mx)
            s = jnp.sum(e, axis=-1, keepdims=True)
            p = e * pl.reciprocal(s, approx=True)                   # softmax
            heads.append(jnp.dot(p, vh, preferred_element_type=jnp.float32))
        outs.append(jnp.concatenate(heads, axis=-1))   # (Tq, D)
    o = jnp.concatenate(outs, axis=0)                  # (B*Tq, D)

    # Output projection: ONE matmul over the concatenated heads.
    x1 = x + jnp.dot(o, wo_t, preferred_element_type=jnp.float32) + bo

    # ---- sublayer[1]: x1 + FFN(LN(x1)) --------------------------------------
    n2 = layer_norm(x1, ln2_a, ln2_b)
    h1 = jnp.maximum(contract_last(n2, w1) + b1, f32(0.0))   # (B*Tq, Dff)
    ff = contract_last(h1, w2) + b2                          # (B*Tq, D)

    out_ref[...] = x1 + ff


# --------------------------------------------------------------------------- #
# One-time host-side parameter packing (do this at init, not per forward)
# --------------------------------------------------------------------------- #
def pack_params(params):
    """Pack all SrcAttLayer parameters into 3 DMA slabs (f32, aligned rows)."""
    f = lambda a: jnp.asarray(a, jnp.float32)
    row = lambda a: f(a).reshape(1, -1)

    wq, wk, wv = f(params["wq"]), f(params["wk"]), f(params["wv"])
    wo_t = f(params["wo"]).T                 # (D_in, D_out)
    w1, w2 = f(params["w1"]), f(params["w2"])
    D = wq.shape[0]
    Dff = w1.shape[0]

    # Slab 1: every weight consumed with lane-width D, stacked along sublanes.
    w32 = jnp.concatenate([wq, wk, wv, wo_t, w1], axis=0)        # (4D+Dff, D)

    # Slab 2: wide slab (lane width max(Dff, 2D)): W2, b1, [bk|bv].
    W = max(Dff, 2 * D)
    pad = lambda a: jnp.pad(a, ((0, 0), (0, W - a.shape[1])))
    bkv = jnp.concatenate([row(params["bk"]), row(params["bv"])], axis=1)
    wide = jnp.concatenate([pad(w2), pad(row(params["b1"])), pad(bkv)], axis=0)

    # Slab 3: D-wide bias / LayerNorm rows.
    b32 = jnp.concatenate([row(params["ln1_a"]), row(params["ln1_b"]),
                           row(params["bq"]), row(params["bo"]),
                           row(params["ln2_a"]), row(params["ln2_b"]),
                           row(params["b2"])], axis=0)           # (7, D)

    return {"w32": w32, "wide": wide, "b32": b32}


# --------------------------------------------------------------------------- #
# Wrapper
# --------------------------------------------------------------------------- #
def src_att_layer_forward(x, memory, src_mask, tgt_mask, packed, *,
                          num_heads, eps=1e-6):
    """Mirror of SrcAttLayer.forward (eval mode). tgt_mask is unused there."""
    del tgt_mask  # not used by SrcAttLayer.forward (src attention only)

    B, Tq, D = x.shape
    Tk = memory.shape[1]
    Dff = packed["w32"].shape[0] - 4 * D

    # Contiguous reshapes (free) + additive mask bias computed on the host.
    x2d = x.astype(jnp.float32).reshape(B * Tq, D)
    m2d = memory.astype(jnp.float32).reshape(B * Tk, D)
    bias = jnp.where(src_mask.reshape(B, Tk) > 0, 0.0, -1e9).astype(jnp.float32)

    kernel = functools.partial(_src_att_layer_kernel,
                               B, Tq, Tk, D, Dff, num_heads, float(eps))

    def full_spec(shape):
        shape = tuple(int(s) for s in shape)
        n = len(shape)
        return pl.BlockSpec(shape, lambda i, _n=n: (0,) * _n)

    args = (x2d, m2d, bias, packed["w32"], packed["wide"], packed["b32"])

    out2d = pl.pallas_call(
        kernel,
        grid=(1,),   # single step: kernel is latency-bound, extra steps = overhead
        out_shape=jax.ShapeDtypeStruct((B * Tq, D), jnp.float32),
        in_specs=[full_spec(a.shape) for a in args],
        out_specs=full_spec((B * Tq, D)),
    )(*args)
    # TODO(synk): on v7x, split B across the 2 TensorCores
    #             (dimension_semantics=(pltpu.CORE_PARALLEL,) or pl.core_map).
    return out2d.reshape(B, Tq, D)


# --------------------------------------------------------------------------- #
# Pure-JAX reference (matches the PyTorch forward in eval mode)
# --------------------------------------------------------------------------- #
def reference_forward(x, memory, src_mask, params, num_heads, eps=1e-6):
    def layer_norm(v, a, b):
        mean = v.mean(-1, keepdims=True)
        var = ((v - mean) ** 2).sum(-1, keepdims=True) / (v.shape[-1] - 1)
        return a * (v - mean) / (jnp.sqrt(var) + eps) + b

    def linear(v, w, b):
        return v @ w.T + b

    B, Tq, D = x.shape
    Tk = memory.shape[1]
    d_k = D // num_heads

    n1 = layer_norm(x, params["ln1_a"], params["ln1_b"])
    q = linear(n1, params["wq"], params["bq"])
    k = linear(memory, params["wk"], params["bk"])
    v = linear(memory, params["wv"], params["bv"])
    q = q.reshape(B, Tq, num_heads, d_k).transpose(0, 2, 1, 3)
    k = k.reshape(B, Tk, num_heads, d_k).transpose(0, 2, 1, 3)
    v = v.reshape(B, Tk, num_heads, d_k).transpose(0, 2, 1, 3)
    scores = jnp.einsum("bhqd,bhkd->bhqk", q, k) / math.sqrt(d_k)
    mask = src_mask.reshape(B, 1, 1, Tk)
    scores = jnp.where(mask > 0, scores, -1e9)
    p = jax.nn.softmax(scores, axis=-1)
    o = jnp.einsum("bhqk,bhkd->bhqd", p, v)
    o = o.transpose(0, 2, 1, 3).reshape(B, Tq, D)
    x1 = x + linear(o, params["wo"], params["bo"])
    n2 = layer_norm(x1, params["ln2_a"], params["ln2_b"])
    ff = linear(jnp.maximum(linear(n2, params["w1"], params["b1"]), 0.0),
                params["w2"], params["b2"])
    return x1 + ff


# --------------------------------------------------------------------------- #
# Main
# --------------------------------------------------------------------------- #
if __name__ == "__main__":
    key = jax.random.PRNGKey(0)
    ks = jax.random.split(key, 16)

    B, Tq, Tk, D, H, Dff = 2, 8, 16, 32, 4, 64

    def lin_init(k, out_f, in_f):
        return jax.random.normal(k, (out_f, in_f), jnp.float32) / math.sqrt(in_f)

    params = {
        "ln1_a": jnp.ones((D,), jnp.float32),
        "ln1_b": jnp.zeros((D,), jnp.float32),
        "wq": lin_init(ks[0], D, D),
        "bq": 0.01 * jax.random.normal(ks[1], (D,), jnp.float32),
        "wk": lin_init(ks[2], D, D),
        "bk": 0.01 * jax.random.normal(ks[3], (D,), jnp.float32),
        "wv": lin_init(ks[4], D, D),
        "bv": 0.01 * jax.random.normal(ks[5], (D,), jnp.float32),
        "wo": lin_init(ks[6], D, D),
        "bo": 0.01 * jax.random.normal(ks[7], (D,), jnp.float32),
        "ln2_a": jnp.ones((D,), jnp.float32),
        "ln2_b": jnp.zeros((D,), jnp.float32),
        "w1": lin_init(ks[8], Dff, D),
        "b1": 0.01 * jax.random.normal(ks[9], (Dff,), jnp.float32),
        "w2": lin_init(ks[10], D, Dff),
        "b2": 0.01 * jax.random.normal(ks[11], (D,), jnp.float32),
    }

    x = jax.random.normal(ks[12], (B, Tq, D), jnp.float32)
    memory = jax.random.normal(ks[13], (B, Tk, D), jnp.float32)
    lengths = jnp.array([Tk, Tk - 4], jnp.int32)
    src_mask = (jnp.arange(Tk)[None, None, :] < lengths[:, None, None]
                ).astype(jnp.float32)                       # (B, 1, Tk)
    tgt_mask = jnp.ones((B, Tq, Tq), jnp.float32)           # unused by this layer

    packed = pack_params(params)                            # one-time init cost

    out = src_att_layer_forward(x, memory, src_mask, tgt_mask, packed,
                                num_heads=H)
    jax.block_until_ready(out)

    ref = reference_forward(x, memory, src_mask, params, H)
    assert out.shape == (B, Tq, D), out.shape
    err = float(jnp.max(jnp.abs(out - ref)))
    assert err < 2e-2, f"max abs err {err}"
    print("KERNEL_OK")
</pallas_src>

<mosaic_0001>
module attributes {stable_mosaic.version = 11 : i64} {
  func.func @_src_att_layer_kernel(%arg0: i32, %arg1: memref<16x32xf32, #tpu.memory_space<vmem>>, %arg2: memref<32x32xf32, #tpu.memory_space<vmem>>, %arg3: memref<2x16xf32, #tpu.memory_space<vmem>>, %arg4: memref<192x32xf32, #tpu.memory_space<vmem>>, %arg5: memref<34x64xf32, #tpu.memory_space<vmem>>, %arg6: memref<7x32xf32, #tpu.memory_space<vmem>>, %arg7: memref<16x32xf32, #tpu.memory_space<vmem>>) attributes {dimension_semantics = [#tpu.dimension_semantics<arbitrary>], iteration_bounds = array<i64: 1>, scalar_prefetch = 0 : i64, scratch_operands = 0 : i64, tpu.core_type = #tpu.core_type<tc>, window_params = [{pipeline_mode = #tpu.pipeline_mode<synchronous>, transform_indices = @transform_0, window_bounds = array<i64: 16, 32>}, {pipeline_mode = #tpu.pipeline_mode<synchronous>, transform_indices = @transform_1, window_bounds = array<i64: 32, 32>}, {pipeline_mode = #tpu.pipeline_mode<synchronous>, transform_indices = @transform_2, window_bounds = array<i64: 2, 16>}, {pipeline_mode = #tpu.pipeline_mode<synchronous>, transform_indices = @transform_3, window_bounds = array<i64: 192, 32>}, {pipeline_mode = #tpu.pipeline_mode<synchronous>, transform_indices = @transform_4, window_bounds = array<i64: 34, 64>}, {pipeline_mode = #tpu.pipeline_mode<synchronous>, transform_indices = @transform_5, window_bounds = array<i64: 7, 32>}, {pipeline_mode = #tpu.pipeline_mode<synchronous>, transform_indices = @transform_6, window_bounds = array<i64: 16, 32>}]} {
    %c0 = arith.constant 0 : index
    %c0_0 = arith.constant 0 : index
    %0 = vector.load %arg1[%c0, %c0_0] : memref<16x32xf32, #tpu.memory_space<vmem>>, vector<16x32xf32>
    %c0_1 = arith.constant 0 : index
    %c0_2 = arith.constant 0 : index
    %1 = vector.load %arg2[%c0_1, %c0_2] : memref<32x32xf32, #tpu.memory_space<vmem>>, vector<32x32xf32>
    %c0_3 = arith.constant 0 : index
    %c0_4 = arith.constant 0 : index
    %2 = vector.load %arg4[%c0_3, %c0_4] : memref<192x32xf32, #tpu.memory_space<vmem>>, vector<32x32xf32>
    %c32 = arith.constant 32 : index
    %c0_5 = arith.constant 0 : index
    %3 = vector.load %arg4[%c32, %c0_5] : memref<192x32xf32, #tpu.memory_space<vmem>>, vector<64x32xf32>
    %c96 = arith.constant 96 : index
    %c0_6 = arith.constant 0 : index
    %4 = vector.load %arg4[%c96, %c0_6] : memref<192x32xf32, #tpu.memory_space<vmem>>, vector<32x32xf32>
    %c128 = arith.constant 128 : index
    %c0_7 = arith.constant 0 : index
    %5 = vector.load %arg4[%c128, %c0_7] : memref<192x32xf32, #tpu.memory_space<vmem>>, vector<64x32xf32>
    %c0_8 = arith.constant 0 : index
    %c0_9 = arith.constant 0 : index
    %6 = vector.load %arg5[%c0_8, %c0_9] : memref<34x64xf32, #tpu.memory_space<vmem>>, vector<32x64xf32>
    %c32_10 = arith.constant 32 : index
    %c0_11 = arith.constant 0 : index
    %7 = vector.load %arg5[%c32_10, %c0_11] : memref<34x64xf32, #tpu.memory_space<vmem>>, vector<1x64xf32>
    %c33 = arith.constant 33 : index
    %c0_12 = arith.constant 0 : index
    %8 = vector.load %arg5[%c33, %c0_12] : memref<34x64xf32, #tpu.memory_space<vmem>>, vector<1x64xf32>
    %c0_13 = arith.constant 0 : index
    %c0_14 = arith.constant 0 : index
    %9 = vector.load %arg6[%c0_13, %c0_14] : memref<7x32xf32, #tpu.memory_space<vmem>>, vector<1x32xf32>
    %c1 = arith.constant 1 : index
    %c0_15 = arith.constant 0 : index
    %10 = vector.load %arg6[%c1, %c0_15] : memref<7x32xf32, #tpu.memory_space<vmem>>, vector<1x32xf32>
    %c2 = arith.constant 2 : index
    %c0_16 = arith.constant 0 : index
    %11 = vector.load %arg6[%c2, %c0_16] : memref<7x32xf32, #tpu.memory_space<vmem>>, vector<1x32xf32>
    %c3 = arith.constant 3 : index
    %c0_17 = arith.constant 0 : index
    %12 = vector.load %arg6[%c3, %c0_17] : memref<7x32xf32, #tpu.memory_space<vmem>>, vector<1x32xf32>
    %c4 = arith.constant 4 : index
    %c0_18 = arith.constant 0 : index
    %13 = vector.load %arg6[%c4, %c0_18] : memref<7x32xf32, #tpu.memory_space<vmem>>, vector<1x32xf32>
    %c5 = arith.constant 5 : index
    %c0_19 = arith.constant 0 : index
    %14 = vector.load %arg6[%c5, %c0_19] : memref<7x32xf32, #tpu.memory_space<vmem>>, vector<1x32xf32>
    %c6 = arith.constant 6 : index
    %c0_20 = arith.constant 0 : index
    %15 = vector.load %arg6[%c6, %c0_20] : memref<7x32xf32, #tpu.memory_space<vmem>>, vector<1x32xf32>
    %cst = arith.constant dense<0.000000e+00> : vector<16xf32>
    %16 = vector.multi_reduction <add>, %0, %cst [1] : vector<16x32xf32> to vector<16xf32>
    %17 = vector.shape_cast %16 : vector<16xf32> to vector<16x1xf32>
    %cst_21 = arith.constant 3.200000e+01 : f32
    %18 = vector.broadcast %cst_21 : f32 to vector<16x1xf32>
    %19 = arith.divf %17, %18 : vector<16x1xf32>
    %20 = vector.broadcast %19 : vector<16x1xf32> to vector<16x32xf32>
    %21 = arith.subf %0, %20 : vector<16x32xf32>
    %22 = vector.broadcast %19 : vector<16x1xf32> to vector<16x32xf32>
    %23 = arith.subf %0, %22 : vector<16x32xf32>
    %24 = arith.mulf %21, %23 : vector<16x32xf32>
    %cst_22 = arith.constant dense<0.000000e+00> : vector<16xf32>
    %25 = vector.multi_reduction <add>, %24, %cst_22 [1] : vector<16x32xf32> to vector<16xf32>
    %26 = vector.shape_cast %25 : vector<16xf32> to vector<16x1xf32>
    %cst_23 = arith.constant 3.100000e+01 : f32
    %27 = vector.broadcast %cst_23 : f32 to vector<16x1xf32>
    %28 = arith.divf %26, %27 : vector<16x1xf32>
    %29 = math.sqrt %28 : vector<16x1xf32>
    %cst_24 = arith.constant 9.99999997E-7 : f32
    %30 = vector.broadcast %cst_24 : f32 to vector<16x1xf32>
    %31 = arith.addf %29, %30 : vector<16x1xf32>
    %32 = tpu.reciprocal %31 {approx = true} : vector<16x1xf32> -> vector<16x1xf32>
    %33 = vector.broadcast %19 : vector<16x1xf32> to vector<16x32xf32>
    %34 = arith.subf %0, %33 : vector<16x32xf32>
    %35 = vector.broadcast %9 : vector<1x32xf32> to vector<16x32xf32>
    %36 = arith.mulf %35, %34 : vector<16x32xf32>
    %37 = vector.broadcast %32 : vector<16x1xf32> to vector<16x32xf32>
    %38 = arith.mulf %36, %37 : vector<16x32xf32>
    %39 = vector.broadcast %10 : vector<1x32xf32> to vector<16x32xf32>
    %40 = arith.addf %38, %39 : vector<16x32xf32>
    %cst_25 = arith.constant dense<0.000000e+00> : vector<16x32xf32>
    %41 = tpu.matmul %40, %2, %cst_25 {dimension_numbers = #tpu.dot_dimension_numbers<[1], [1], [0], [0], [0, 0, 1, 0], [], []>} : vector<16x32xf32>, vector<32x32xf32>, vector<16x32xf32> -> vector<16x32xf32>
    %42 = vector.broadcast %11 : vector<1x32xf32> to vector<16x32xf32>
    %43 = arith.addf %41, %42 : vector<16x32xf32>
    %cst_26 = arith.constant dense<0.000000e+00> : vector<32x64xf32>
    %44 = tpu.matmul %1, %3, %cst_26 {dimension_numbers = #tpu.dot_dimension_numbers<[1], [1], [0], [0], [0, 0, 1, 0], [], []>} : vector<32x32xf32>, vector<64x32xf32>, vector<32x64xf32> -> vector<32x64xf32>
    %45 = vector.broadcast %8 : vector<1x64xf32> to vector<32x64xf32>
    %46 = arith.addf %44, %45 : vector<32x64xf32>
    %c0_27 = arith.constant 0 : index
    %c0_28 = arith.constant 0 : index
    %47 = vector.load %arg3[%c0_27, %c0_28] : memref<2x16xf32, #tpu.memory_space<vmem>>, vector<1x16xf32>
    %48 = vector.extract_strided_slice %43 {offsets = [0, 0], sizes = [8, 8], strides = [1, 1]} : vector<16x32xf32> to vector<8x8xf32>
    %49 = vector.extract_strided_slice %46 {offsets = [0, 0], sizes = [16, 8], strides = [1, 1]} : vector<32x64xf32> to vector<16x8xf32>
    %50 = vector.extract_strided_slice %46 {offsets = [0, 32], sizes = [16, 8], strides = [1, 1]} : vector<32x64xf32> to vector<16x8xf32>
    %cst_29 = arith.constant dense<0.000000e+00> : vector<8x16xf32>
    %51 = tpu.matmul %48, %49, %cst_29 {dimension_numbers = #tpu.dot_dimension_numbers<[1], [1], [0], [0], [0, 0, 1, 0], [], []>} : vector<8x8xf32>, vector<16x8xf32>, vector<8x16xf32> -> vector<8x16xf32>
    %cst_30 = arith.constant 0.353553385 : f32
    %52 = vector.broadcast %cst_30 : f32 to vector<8x16xf32>
    %53 = arith.mulf %51, %52 : vector<8x16xf32>
    %54 = vector.broadcast %47 : vector<1x16xf32> to vector<8x16xf32>
    %55 = arith.addf %53, %54 : vector<8x16xf32>
    %cst_31 = arith.constant dense<0xFF800000> : vector<8xf32>
    %56 = vector.multi_reduction <maximumf>, %55, %cst_31 [1] : vector<8x16xf32> to vector<8xf32>
    %57 = vector.shape_cast %56 : vector<8xf32> to vector<8x1xf32>
    %58 = vector.broadcast %57 : vector<8x1xf32> to vector<8x16xf32>
    %59 = arith.subf %55, %58 : vector<8x16xf32>
    %60 = math.exp %59 : vector<8x16xf32>
    %cst_32 = arith.constant dense<0.000000e+00> : vector<8xf32>
    %61 = vector.multi_reduction <add>, %60, %cst_32 [1] : vector<8x16xf32> to vector<8xf32>
    %62 = vector.shape_cast %61 : vector<8xf32> to vector<8x1xf32>
    %63 = tpu.reciprocal %62 {approx = true} : vector<8x1xf32> -> vector<8x1xf32>
    %64 = vector.broadcast %63 : vector<8x1xf32> to vector<8x16xf32>
    %65 = arith.mulf %60, %64 : vector<8x16xf32>
    %cst_33 = arith.constant dense<0.000000e+00> : vector<8x8xf32>
    %66 = tpu.matmul %65, %50, %cst_33 {dimension_numbers = #tpu.dot_dimension_numbers<[1], [0], [0], [1], [0, 0, 1, 1], [], []>} : vector<8x16xf32>, vector<16x8xf32>, vector<8x8xf32> -> vector<8x8xf32>
    %67 = vector.extract_strided_slice %43 {offsets = [0, 8], sizes = [8, 8], strides = [1, 1]} : vector<16x32xf32> to vector<8x8xf32>
    %68 = vector.extract_strided_slice %46 {offsets = [0, 8], sizes = [16, 8], strides = [1, 1]} : vector<32x64xf32> to vector<16x8xf32>
    %69 = vector.extract_strided_slice %46 {offsets = [0, 40], sizes = [16, 8], strides = [1, 1]} : vector<32x64xf32> to vector<16x8xf32>
    %cst_34 = arith.constant dense<0.000000e+00> : vector<8x16xf32>
    %70 = tpu.matmul %67, %68, %cst_34 {dimension_numbers = #tpu.dot_dimension_numbers<[1], [1], [0], [0], [0, 0, 1, 0], [], []>} : vector<8x8xf32>, vector<16x8xf32>, vector<8x16xf32> -> vector<8x16xf32>
    %cst_35 = arith.constant 0.353553385 : f32
    %71 = vector.broadcast %cst_35 : f32 to vector<8x16xf32>
    %72 = arith.mulf %70, %71 : vector<8x16xf32>
    %73 = vector.broadcast %47 : vector<1x16xf32> to vector<8x16xf32>
    %74 = arith.addf %72, %73 : vector<8x16xf32>
    %cst_36 = arith.constant dense<0xFF800000> : vector<8xf32>
    %75 = vector.multi_reduction <maximumf>, %74, %cst_36 [1] : vector<8x16xf32> to vector<8xf32>
    %76 = vector.shape_cast %75 : vector<8xf32> to vector<8x1xf32>
    %77 = vector.broadcast %76 : vector<8x1xf32> to vector<8x16xf32>
    %78 = arith.subf %74, %77 : vector<8x16xf32>
    %79 = math.exp %78 : vector<8x16xf32>
    %cst_37 = arith.constant dense<0.000000e+00> : vector<8xf32>
    %80 = vector.multi_reduction <add>, %79, %cst_37 [1] : vector<8x16xf32> to vector<8xf32>
    %81 = vector.shape_cast %80 : vector<8xf32> to vector<8x1xf32>
    %82 = tpu.reciprocal %81 {approx = true} : vector<8x1xf32> -> vector<8x1xf32>
    %83 = vector.broadcast %82 : vector<8x1xf32> to vector<8x16xf32>
    %84 = arith.mulf %79, %83 : vector<8x16xf32>
    %cst_38 = arith.constant dense<0.000000e+00> : vector<8x8xf32>
    %85 = tpu.matmul %84, %69, %cst_38 {dimension_numbers = #tpu.dot_dimension_numbers<[1], [0], [0], [1], [0, 0, 1, 1], [], []>} : vector<8x16xf32>, vector<16x8xf32>, vector<8x8xf32> -> vector<8x8xf32>
    %86 = vector.extract_strided_slice %43 {offsets = [0, 16], sizes = [8, 8], strides = [1, 1]} : vector<16x32xf32> to vector<8x8xf32>
    %87 = vector.extract_strided_slice %46 {offsets = [0, 16], sizes = [16, 8], strides = [1, 1]} : vector<32x64xf32> to vector<16x8xf32>
    %88 = vector.extract_strided_slice %46 {offsets = [0, 48], sizes = [16, 8], strides = [1, 1]} : vector<32x64xf32> to vector<16x8xf32>
    %cst_39 = arith.constant dense<0.000000e+00> : vector<8x16xf32>
    %89 = tpu.matmul %86, %87, %cst_39 {dimension_numbers = #tpu.dot_dimension_numbers<[1], [1], [0], [0], [0, 0, 1, 0], [], []>} : vector<8x8xf32>, vector<16x8xf32>, vector<8x16xf32> -> vector<8x16xf32>
    %cst_40 = arith.constant 0.353553385 : f32
    %90 = vector.broadcast %cst_40 : f32 to vector<8x16xf32>
    %91 = arith.mulf %89, %90 : vector<8x16xf32>
    %92 = vector.broadcast %47 : vector<1x16xf32> to vector<8x16xf32>
    %93 = arith.addf %91, %92 : vector<8x16xf32>
    %cst_41 = arith.constant dense<0xFF800000> : vector<8xf32>
    %94 = vector.multi_reduction <maximumf>, %93, %cst_41 [1] : vector<8x16xf32> to vector<8xf32>
    %95 = vector.shape_cast %94 : vector<8xf32> to vector<8x1xf32>
    %96 = vector.broadcast %95 : vector<8x1xf32> to vector<8x16xf32>
    %97 = arith.subf %93, %96 : vector<8x16xf32>
    %98 = math.exp %97 : vector<8x16xf32>
    %cst_42 = arith.constant dense<0.000000e+00> : vector<8xf32>
    %99 = vector.multi_reduction <add>, %98, %cst_42 [1] : vector<8x16xf32> to vector<8xf32>
    %100 = vector.shape_cast %99 : vector<8xf32> to vector<8x1xf32>
    %101 = tpu.reciprocal %100 {approx = true} : vector<8x1xf32> -> vector<8x1xf32>
    %102 = vector.broadcast %101 : vector<8x1xf32> to vector<8x16xf32>
    %103 = arith.mulf %98, %102 : vector<8x16xf32>
    %cst_43 = arith.constant dense<0.000000e+00> : vector<8x8xf32>
    %104 = tpu.matmul %103, %88, %cst_43 {dimension_numbers = #tpu.dot_dimension_numbers<[1], [0], [0], [1], [0, 0, 1, 1], [], []>} : vector<8x16xf32>, vector<16x8xf32>, vector<8x8xf32> -> vector<8x8xf32>
    %105 = vector.extract_strided_slice %43 {offsets = [0, 24], sizes = [8, 8], strides = [1, 1]} : vector<16x32xf32> to vector<8x8xf32>
    %106 = vector.extract_strided_slice %46 {offsets = [0, 24], sizes = [16, 8], strides = [1, 1]} : vector<32x64xf32> to vector<16x8xf32>
    %107 = vector.extract_strided_slice %46 {offsets = [0, 56], sizes = [16, 8], strides = [1, 1]} : vector<32x64xf32> to vector<16x8xf32>
    %cst_44 = arith.constant dense<0.000000e+00> : vector<8x16xf32>
    %108 = tpu.matmul %105, %106, %cst_44 {dimension_numbers = #tpu.dot_dimension_numbers<[1], [1], [0], [0], [0, 0, 1, 0], [], []>} : vector<8x8xf32>, vector<16x8xf32>, vector<8x16xf32> -> vector<8x16xf32>
    %cst_45 = arith.constant 0.353553385 : f32
    %109 = vector.broadcast %cst_45 : f32 to vector<8x16xf32>
    %110 = arith.mulf %108, %109 : vector<8x16xf32>
    %111 = vector.broadcast %47 : vector<1x16xf32> to vector<8x16xf32>
    %112 = arith.addf %110, %111 : vector<8x16xf32>
    %cst_46 = arith.constant dense<0xFF800000> : vector<8xf32>
    %113 = vector.multi_reduction <maximumf>, %112, %cst_46 [1] : vector<8x16xf32> to vector<8xf32>
    %114 = vector.shape_cast %113 : vector<8xf32> to vector<8x1xf32>
    %115 = vector.broadcast %114 : vector<8x1xf32> to vector<8x16xf32>
    %116 = arith.subf %112, %115 : vector<8x16xf32>
    %117 = math.exp %116 : vector<8x16xf32>
    %cst_47 = arith.constant dense<0.000000e+00> : vector<8xf32>
    %118 = vector.multi_reduction <add>, %117, %cst_47 [1] : vector<8x16xf32> to vector<8xf32>
    %119 = vector.shape_cast %118 : vector<8xf32> to vector<8x1xf32>
    %120 = tpu.reciprocal %119 {approx = true} : vector<8x1xf32> -> vector<8x1xf32>
    %121 = vector.broadcast %120 : vector<8x1xf32> to vector<8x16xf32>
    %122 = arith.mulf %117, %121 : vector<8x16xf32>
    %cst_48 = arith.constant dense<0.000000e+00> : vector<8x8xf32>
    %123 = tpu.matmul %122, %107, %cst_48 {dimension_numbers = #tpu.dot_dimension_numbers<[1], [0], [0], [1], [0, 0, 1, 1], [], []>} : vector<8x16xf32>, vector<16x8xf32>, vector<8x8xf32> -> vector<8x8xf32>
    %124 = tpu.concatenate %66, %85, %104, %123 in 1 : vector<8x8xf32>, vector<8x8xf32>, vector<8x8xf32>, vector<8x8xf32> -> vector<8x32xf32>
    %c1_49 = arith.constant 1 : index
    %c0_50 = arith.constant 0 : index
    %125 = vector.load %arg3[%c1_49, %c0_50] : memref<2x16xf32, #tpu.memory_space<vmem>>, vector<1x16xf32>
    %126 = vector.extract_strided_slice %43 {offsets = [8, 0], sizes = [8, 8], strides = [1, 1]} : vector<16x32xf32> to vector<8x8xf32>
    %127 = vector.extract_strided_slice %46 {offsets = [16, 0], sizes = [16, 8], strides = [1, 1]} : vector<32x64xf32> to vector<16x8xf32>
    %128 = vector.extract_strided_slice %46 {offsets = [16, 32], sizes = [16, 8], strides = [1, 1]} : vector<32x64xf32> to vector<16x8xf32>
    %cst_51 = arith.constant dense<0.000000e+00> : vector<8x16xf32>
    %129 = tpu.matmul %126, %127, %cst_51 {dimension_numbers = #tpu.dot_dimension_numbers<[1], [1], [0], [0], [0, 0, 1, 0], [], []>} : vector<8x8xf32>, vector<16x8xf32>, vector<8x16xf32> -> vector<8x16xf32>
    %cst_52 = arith.constant 0.353553385 : f32
    %130 = vector.broadcast %cst_52 : f32 to vector<8x16xf32>
    %131 = arith.mulf %129, %130 : vector<8x16xf32>
    %132 = vector.broadcast %125 : vector<1x16xf32> to vector<8x16xf32>
    %133 = arith.addf %131, %132 : vector<8x16xf32>
    %cst_53 = arith.constant dense<0xFF800000> : vector<8xf32>
    %134 = vector.multi_reduction <maximumf>, %133, %cst_53 [1] : vector<8x16xf32> to vector<8xf32>
    %135 = vector.shape_cast %134 : vector<8xf32> to vector<8x1xf32>
    %136 = vector.broadcast %135 : vector<8x1xf32> to vector<8x16xf32>
    %137 = arith.subf %133, %136 : vector<8x16xf32>
    %138 = math.exp %137 : vector<8x16xf32>
    %cst_54 = arith.constant dense<0.000000e+00> : vector<8xf32>
    %139 = vector.multi_reduction <add>, %138, %cst_54 [1] : vector<8x16xf32> to vector<8xf32>
    %140 = vector.shape_cast %139 : vector<8xf32> to vector<8x1xf32>
    %141 = tpu.reciprocal %140 {approx = true} : vector<8x1xf32> -> vector<8x1xf32>
    %142 = vector.broadcast %141 : vector<8x1xf32> to vector<8x16xf32>
    %143 = arith.mulf %138, %142 : vector<8x16xf32>
    %cst_55 = arith.constant dense<0.000000e+00> : vector<8x8xf32>
    %144 = tpu.matmul %143, %128, %cst_55 {dimension_numbers = #tpu.dot_dimension_numbers<[1], [0], [0], [1], [0, 0, 1, 1], [], []>} : vector<8x16xf32>, vector<16x8xf32>, vector<8x8xf32> -> vector<8x8xf32>
    %145 = vector.extract_strided_slice %43 {offsets = [8, 8], sizes = [8, 8], strides = [1, 1]} : vector<16x32xf32> to vector<8x8xf32>
    %146 = vector.extract_strided_slice %46 {offsets = [16, 8], sizes = [16, 8], strides = [1, 1]} : vector<32x64xf32> to vector<16x8xf32>
    %147 = vector.extract_strided_slice %46 {offsets = [16, 40], sizes = [16, 8], strides = [1, 1]} : vector<32x64xf32> to vector<16x8xf32>
    %cst_56 = arith.constant dense<0.000000e+00> : vector<8x16xf32>
    %148 = tpu.matmul %145, %146, %cst_56 {dimension_numbers = #tpu.dot_dimension_numbers<[1], [1], [0], [0], [0, 0, 1, 0], [], []>} : vector<8x8xf32>, vector<16x8xf32>, vector<8x16xf32> -> vector<8x16xf32>
    %cst_57 = arith.constant 0.353553385 : f32
    %149 = vector.broadcast %cst_57 : f32 to vector<8x16xf32>
    %150 = arith.mulf %148, %149 : vector<8x16xf32>
    %151 = vector.broadcast %125 : vector<1x16xf32> to vector<8x16xf32>
    %152 = arith.addf %150, %151 : vector<8x16xf32>
    %cst_58 = arith.constant dense<0xFF800000> : vector<8xf32>
    %153 = vector.multi_reduction <maximumf>, %152, %cst_58 [1] : vector<8x16xf32> to vector<8xf32>
    %154 = vector.shape_cast %153 : vector<8xf32> to vector<8x1xf32>
    %155 = vector.broadcast %154 : vector<8x1xf32> to vector<8x16xf32>
    %156 = arith.subf %152, %155 : vector<8x16xf32>
    %157 = math.exp %156 : vector<8x16xf32>
    %cst_59 = arith.constant dense<0.000000e+00> : vector<8xf32>
    %158 = vector.multi_reduction <add>, %157, %cst_59 [1] : vector<8x16xf32> to vector<8xf32>
    %159 = vector.shape_cast %158 : vector<8xf32> to vector<8x1xf32>
    %160 = tpu.reciprocal %159 {approx = true} : vector<8x1xf32> -> vector<8x1xf32>
    %161 = vector.broadcast %160 : vector<8x1xf32> to vector<8x16xf32>
    %162 = arith.mulf %157, %161 : vector<8x16xf32>
    %cst_60 = arith.constant dense<0.000000e+00> : vector<8x8xf32>
    %163 = tpu.matmul %162, %147, %cst_60 {dimension_numbers = #tpu.dot_dimension_numbers<[1], [0], [0], [1], [0, 0, 1, 1], [], []>} : vector<8x16xf32>, vector<16x8xf32>, vector<8x8xf32> -> vector<8x8xf32>
    %164 = vector.extract_strided_slice %43 {offsets = [8, 16], sizes = [8, 8], strides = [1, 1]} : vector<16x32xf32> to vector<8x8xf32>
    %165 = vector.extract_strided_slice %46 {offsets = [16, 16], sizes = [16, 8], strides = [1, 1]} : vector<32x64xf32> to vector<16x8xf32>
    %166 = vector.extract_strided_slice %46 {offsets = [16, 48], sizes = [16, 8], strides = [1, 1]} : vector<32x64xf32> to vector<16x8xf32>
    %cst_61 = arith.constant dense<0.000000e+00> : vector<8x16xf32>
    %167 = tpu.matmul %164, %165, %cst_61 {dimension_numbers = #tpu.dot_dimension_numbers<[1], [1], [0], [0], [0, 0, 1, 0], [], []>} : vector<8x8xf32>, vector<16x8xf32>, vector<8x16xf32> -> vector<8x16xf32>
    %cst_62 = arith.constant 0.353553385 : f32
    %168 = vector.broadcast %cst_62 : f32 to vector<8x16xf32>
    %169 = arith.mulf %167, %168 : vector<8x16xf32>
    %170 = vector.broadcast %125 : vector<1x16xf32> to vector<8x16xf32>
    %171 = arith.addf %169, %170 : vector<8x16xf32>
    %cst_63 = arith.constant dense<0xFF800000> : vector<8xf32>
    %172 = vector.multi_reduction <maximumf>, %171, %cst_63 [1] : vector<8x16xf32> to vector<8xf32>
    %173 = vector.shape_cast %172 : vector<8xf32> to vector<8x1xf32>
    %174 = vector.broadcast %173 : vector<8x1xf32> to vector<8x16xf32>
    %175 = arith.subf %171, %174 : vector<8x16xf32>
    %176 = math.exp %175 : vector<8x16xf32>
    %cst_64 = arith.constant dense<0.000000e+00> : vector<8xf32>
    %177 = vector.multi_reduction <add>, %176, %cst_64 [1] : vector<8x16xf32> to vector<8xf32>
    %178 = vector.shape_cast %177 : vector<8xf32> to vector<8x1xf32>
    %179 = tpu.reciprocal %178 {approx = true} : vector<8x1xf32> -> vector<8x1xf32>
    %180 = vector.broadcast %179 : vector<8x1xf32> to vector<8x16xf32>
    %181 = arith.mulf %176, %180 : vector<8x16xf32>
    %cst_65 = arith.constant dense<0.000000e+00> : vector<8x8xf32>
    %182 = tpu.matmul %181, %166, %cst_65 {dimension_numbers = #tpu.dot_dimension_numbers<[1], [0], [0], [1], [0, 0, 1, 1], [], []>} : vector<8x16xf32>, vector<16x8xf32>, vector<8x8xf32> -> vector<8x8xf32>
    %183 = vector.extract_strided_slice %43 {offsets = [8, 24], sizes = [8, 8], strides = [1, 1]} : vector<16x32xf32> to vector<8x8xf32>
    %184 = vector.extract_strided_slice %46 {offsets = [16, 24], sizes = [16, 8], strides = [1, 1]} : vector<32x64xf32> to vector<16x8xf32>
    %185 = vector.extract_strided_slice %46 {offsets = [16, 56], sizes = [16, 8], strides = [1, 1]} : vector<32x64xf32> to vector<16x8xf32>
    %cst_66 = arith.constant dense<0.000000e+00> : vector<8x16xf32>
    %186 = tpu.matmul %183, %184, %cst_66 {dimension_numbers = #tpu.dot_dimension_numbers<[1], [1], [0], [0], [0, 0, 1, 0], [], []>} : vector<8x8xf32>, vector<16x8xf32>, vector<8x16xf32> -> vector<8x16xf32>
    %cst_67 = arith.constant 0.353553385 : f32
    %187 = vector.broadcast %cst_67 : f32 to vector<8x16xf32>
    %188 = arith.mulf %186, %187 : vector<8x16xf32>
    %189 = vector.broadcast %125 : vector<1x16xf32> to vector<8x16xf32>
    %190 = arith.addf %188, %189 : vector<8x16xf32>
    %cst_68 = arith.constant dense<0xFF800000> : vector<8xf32>
    %191 = vector.multi_reduction <maximumf>, %190, %cst_68 [1] : vector<8x16xf32> to vector<8xf32>
    %192 = vector.shape_cast %191 : vector<8xf32> to vector<8x1xf32>
    %193 = vector.broadcast %192 : vector<8x1xf32> to vector<8x16xf32>
    %194 = arith.subf %190, %193 : vector<8x16xf32>
    %195 = math.exp %194 : vector<8x16xf32>
    %cst_69 = arith.constant dense<0.000000e+00> : vector<8xf32>
    %196 = vector.multi_reduction <add>, %195, %cst_69 [1] : vector<8x16xf32> to vector<8xf32>
    %197 = vector.shape_cast %196 : vector<8xf32> to vector<8x1xf32>
    %198 = tpu.reciprocal %197 {approx = true} : vector<8x1xf32> -> vector<8x1xf32>
    %199 = vector.broadcast %198 : vector<8x1xf32> to vector<8x16xf32>
    %200 = arith.mulf %195, %199 : vector<8x16xf32>
    %cst_70 = arith.constant dense<0.000000e+00> : vector<8x8xf32>
    %201 = tpu.matmul %200, %185, %cst_70 {dimension_numbers = #tpu.dot_dimension_numbers<[1], [0], [0], [1], [0, 0, 1, 1], [], []>} : vector<8x16xf32>, vector<16x8xf32>, vector<8x8xf32> -> vector<8x8xf32>
    %202 = tpu.concatenate %144, %163, %182, %201 in 1 : vector<8x8xf32>, vector<8x8xf32>, vector<8x8xf32>, vector<8x8xf32> -> vector<8x32xf32>
    %203 = tpu.concatenate %124, %202 in 0 : vector<8x32xf32>, vector<8x32xf32> -> vector<16x32xf32>
    %cst_71 = arith.constant dense<0.000000e+00> : vector<16x32xf32>
    %204 = tpu.matmul %203, %4, %cst_71 {dimension_numbers = #tpu.dot_dimension_numbers<[1], [0], [0], [1], [0, 0, 1, 1], [], []>} : vector<16x32xf32>, vector<32x32xf32>, vector<16x32xf32> -> vector<16x32xf32>
    %205 = arith.addf %0, %204 : vector<16x32xf32>
    %206 = vector.broadcast %12 : vector<1x32xf32> to vector<16x32xf32>
    %207 = arith.addf %205, %206 : vector<16x32xf32>
    %cst_72 = arith.constant dense<0.000000e+00> : vector<16xf32>
    %208 = vector.multi_reduction <add>, %207, %cst_72 [1] : vector<16x32xf32> to vector<16xf32>
    %209 = vector.shape_cast %208 : vector<16xf32> to vector<16x1xf32>
    %cst_73 = arith.constant 3.200000e+01 : f32
    %210 = vector.broadcast %cst_73 : f32 to vector<16x1xf32>
    %211 = arith.divf %209, %210 : vector<16x1xf32>
    %212 = vector.broadcast %211 : vector<16x1xf32> to vector<16x32xf32>
    %213 = arith.subf %207, %212 : vector<16x32xf32>
    %214 = vector.broadcast %211 : vector<16x1xf32> to vector<16x32xf32>
    %215 = arith.subf %207, %214 : vector<16x32xf32>
    %216 = arith.mulf %213, %215 : vector<16x32xf32>
    %cst_74 = arith.constant dense<0.000000e+00> : vector<16xf32>
    %217 = vector.multi_reduction <add>, %216, %cst_74 [1] : vector<16x32xf32> to vector<16xf32>
    %218 = vector.shape_cast %217 : vector<16xf32> to vector<16x1xf32>
    %cst_75 = arith.constant 3.100000e+01 : f32
    %219 = vector.broadcast %cst_75 : f32 to vector<16x1xf32>
    %220 = arith.divf %218, %219 : vector<16x1xf32>
    %221 = math.sqrt %220 : vector<16x1xf32>
    %cst_76 = arith.constant 9.99999997E-7 : f32
    %222 = vector.broadcast %cst_76 : f32 to vector<16x1xf32>
    %223 = arith.addf %221, %222 : vector<16x1xf32>
    %224 = tpu.reciprocal %223 {approx = true} : vector<16x1xf32> -> vector<16x1xf32>
    %225 = vector.broadcast %211 : vector<16x1xf32> to vector<16x32xf32>
    %226 = arith.subf %207, %225 : vector<16x32xf32>
    %227 = vector.broadcast %13 : vector<1x32xf32> to vector<16x32xf32>
    %228 = arith.mulf %227, %226 : vector<16x32xf32>
    %229 = vector.broadcast %224 : vector<16x1xf32> to vector<16x32xf32>
    %230 = arith.mulf %228, %229 : vector<16x32xf32>
    %231 = vector.broadcast %14 : vector<1x32xf32> to vector<16x32xf32>
    %232 = arith.addf %230, %231 : vector<16x32xf32>
    %cst_77 = arith.constant dense<0.000000e+00> : vector<16x64xf32>
    %233 = tpu.matmul %232, %5, %cst_77 {dimension_numbers = #tpu.dot_dimension_numbers<[1], [1], [0], [0], [0, 0, 1, 0], [], []>} : vector<16x32xf32>, vector<64x32xf32>, vector<16x64xf32> -> vector<16x64xf32>
    %234 = vector.broadcast %7 : vector<1x64xf32> to vector<16x64xf32>
    %235 = arith.addf %233, %234 : vector<16x64xf32>
    %cst_78 = arith.constant 0.000000e+00 : f32
    %236 = vector.broadcast %cst_78 : f32 to vector<16x64xf32>
    %237 = arith.maximumf %235, %236 : vector<16x64xf32>
    %cst_79 = arith.constant dense<0.000000e+00> : vector<16x32xf32>
    %238 = tpu.matmul %237, %6, %cst_79 {dimension_numbers = #tpu.dot_dimension_numbers<[1], [1], [0], [0], [0, 0, 1, 0], [], []>} : vector<16x64xf32>, vector<32x64xf32>, vector<16x32xf32> -> vector<16x32xf32>
    %239 = vector.broadcast %15 : vector<1x32xf32> to vector<16x32xf32>
    %240 = arith.addf %238, %239 : vector<16x32xf32>
    %241 = arith.addf %207, %240 : vector<16x32xf32>
    %c0_80 = arith.constant 0 : index
    %c0_81 = arith.constant 0 : index
    %242 = vector.load %arg7[%c0_80, %c0_81] : memref<16x32xf32, #tpu.memory_space<vmem>>, vector<16x32xf32>
    tpu.vector_store %arg7[%c0_80, %c0_81], %241 {strides = array<i32>} : memref<16x32xf32, #tpu.memory_space<vmem>>, vector<16x32xf32>,
    return
  }
  func.func @transform_0(%arg0: i32) -> (i32, i32) {
    %c0_i32 = arith.constant 0 : i32
    %c0_i32_0 = arith.constant 0 : i32
    %c0_i32_1 = arith.constant 0 : i32
    return %c0_i32, %c0_i32_0 : i32, i32
  }
  func.func @transform_1(%arg0: i32) -> (i32, i32) {
    %c0_i32 = arith.constant 0 : i32
    %c0_i32_0 = arith.constant 0 : i32
    %c0_i32_1 = arith.constant 0 : i32
    return %c0_i32, %c0_i32_0 : i32, i32
  }
  func.func @transform_2(%arg0: i32) -> (i32, i32) {
    %c0_i32 = arith.constant 0 : i32
    %c0_i32_0 = arith.constant 0 : i32
    %c0_i32_1 = arith.constant 0 : i32
    return %c0_i32, %c0_i32_0 : i32, i32
  }
  func.func @transform_3(%arg0: i32) -> (i32, i32) {
    %c0_i32 = arith.constant 0 : i32
    %c0_i32_0 = arith.constant 0 : i32
    %c0_i32_1 = arith.constant 0 : i32
    return %c0_i32, %c0_i32_0 : i32, i32
  }
  func.func @transform_4(%arg0: i32) -> (i32, i32) {
    %c0_i32 = arith.constant 0 : i32
    %c0_i32_0 = arith.constant 0 : i32
    %c0_i32_1 = arith.constant 0 : i32
    return %c0_i32, %c0_i32_0 : i32, i32
  }
  func.func @transform_5(%arg0: i32) -> (i32, i32) {
    %c0_i32 = arith.constant 0 : i32
    %c0_i32_0 = arith.constant 0 : i32
    %c0_i32_1 = arith.constant 0 : i32
    return %c0_i32, %c0_i32_0 : i32, i32
  }
  func.func @transform_6(%arg0: i32) -> (i32, i32) {
    %c0_i32 = arith.constant 0 : i32
    %c0_i32_0 = arith.constant 0 : i32
    %c0_i32_1 = arith.constant 0 : i32
    return %c0_i32, %c0_i32_0 : i32, i32
  }
}

</mosaic_0001>

<bundles_post_ra>
// kernel: tpu_custom_call.1
= control target key start
LH: loop header
LB: loop body
LE: loop exit
PB: predicated region body
PF: predicated region fallthrough
CT: control target
= control target key end

     0   :  { %vm67_vm0 = vcmask 261120   ;;  %s3301_s0 = inlined_call_operand.vmem [shape: f32[16,32], index: 0, kind: input, shape index: {}]   ;;  %s3302_s1 = inlined_call_operand.vmem [shape: f32[32,32], index: 1, kind: input, shape index: {}]   ;;  %s3303_s2 = inlined_call_operand.vmem [shape: f32[2,16], index: 2, kind: input, shape index: {}]   ;;  %s3304_s3 = inlined_call_operand.vmem [shape: f32[192,32], index: 3, kind: input, shape index: {}]   ;;  %s3305_s4 = inlined_call_operand.vmem [shape: f32[34,64], index: 4, kind: input, shape index: {}]   ;;  %s3306_s5 = inlined_call_operand.vmem [shape: f32[7,32], index: 5, kind: input, shape index: {}]   ;;  %s3307_s6 = inlined_call_operand.hbm [shape: f32[16,32], index: 6, kind: output, shape index: {}]  }
   0x1   :  { %v2842_v0 = vld [vmem:[%s3301_s0] sm:$0xff]  ;;  %v2847_v1 = vld [vmem:[%s3301_s0 + $0x8] sm:$0xff] }
   0x2   :  { %v68_v2 = vsel %vm67_vm0, %v2842_v0, 0.0 }
   0x3   :  { %11 = vsyncpa [#allocation3], 0  ;;  %69 = vadd.xlane.f32.xlu0 %v68_v2  ;;  %v71_v3 = vsel %vm67_vm0, %v2847_v1, 0.0  ;;  %v34_v4 = vld [vmem:[%s3304_s3 + $0x20] sm:$0xff]  ;;  %v35_v5 = vld [vmem:[%s3304_s3 + $0x28] sm:$0xff]  ;;  %v2789_v35 = vmov 0.0|0.0  }
   0x4   :  { %vm2861_vm1 = vmpackc.low %vm67_vm0, %vm67_vm0  ;;  %v2508_v7 = vpack.c.bf16 %v35_v5, %v34_v4  ;;  %v36_v18 = vld [vmem:[%s3304_s3 + $0x30] sm:$0xff]  ;;  %v37_v19 = vld [vmem:[%s3304_s3 + $0x38] sm:$0xff]  ;;  %vm345_vm6 = vcmask 64512   ;;  %s2790_s9 = smov 120   ;;  %s2791_s10 = smov 112   ;;  %vm2792_vm8 = vmmov 0  }
   0x5   :  { %v2514_v20 = vpack.c.bf16 %v37_v19, %v36_v18  ;;  %v38_v21 = vld [vmem:[%s3304_s3 + $0x40] sm:$0xff]  ;;  %v39_v22 = vld [vmem:[%s3304_s3 + $0x48] sm:$0xff]  ;;  %v40_v24 = vld [vmem:[%s3304_s3 + $0x50] sm:$0xff]  ;;  %vm431_vm9 = vcmask 130048   ;;  %s2794_s19 = smov 96   ;;  %s2795_s20 = smov 104  }
   0x6   :  { %2510 = vmatprep.subr.msk.bf16.mxu1 %vm2861_vm1, %v2508_v7  ;;  %v2520_v23 = vpack.c.bf16 %v39_v22, %v38_v21  ;;  %v41_v25 = vld [vmem:[%s3304_s3 + $0x58] sm:$0xff]  ;;  %v30_v27 = vld [vmem:[%s3304_s3] sm:$0xff]  ;;  %v31_v28 = vld [vmem:[%s3304_s3 + $0x8] sm:$0xff]  ;;  %s2797_s21 = smov 72   ;;  %s2798_s22 = smov 80   ;;  %vm1058_vm10 = vcmask 195584  }
   0x7   :  { %72 = vadd.xlane.f32.xlu0 %v71_v3  ;;  %2513 = vmatpush3.bf16.xpose.msk.msra.mxu1 %vm2861_vm1, %v2508_v7  ;;  %v2526_v26 = vpack.c.bf16 %v41_v25, %v40_v24  ;;  %v26_v29 = vld [vmem:[%s3302_s1] sm:$0xff]  ;;  %v2496_v30 = vpack.c.bf16 %v31_v28, %v30_v27  ;;  %v32_v31 = vld [vmem:[%s3304_s3 + $0x10] sm:$0xff]  ;;  %v33_v32 = vld [vmem:[%s3304_s3 + $0x18] sm:$0xff]  ;;  %s2800_s25 = smov 16   ;;  %s2801_s26 = smov 24   ;;  %vm2029_vm11 = vcmask 523264  }
   0x8   :  { %2516 = vmatprep.subr.msk.bf16.mxu1 %vm2861_vm1, %v2514_v20  ;;  %2337 = vmatprep.mubr.msk.f32.mxu1 %vm67_vm0, %v26_v29  ;;  %v27_v33 = vld [vmem:[%s3302_s1 + $0x8] sm:$0xff]  ;;  %v2502_v34 = vpack.c.bf16 %v33_v32, %v32_v31  ;;  %v2143_v52 = vld [vmem:[%s3306_s5] ss:$0 sm:$0xff]  ;;  %v2144_v55 = vld [vmem:[%s3306_s5 + $0x1] ss:$0 sm:$0xff]  ;;  %s2802_s17 = smov [#allocation2]  }
   0x9   :  { %2498 = vmatprep.subr.msk.bf16.mxu0 %vm2861_vm1, %v2496_v30  ;;  %v2954_v62 = vld [vmem:[%s3305_s4 + $0x21] ss:$0 sm:$0xff]  ;;  %vm2960_vm7 = vmpackc.low %vm345_vm6, %vm345_vm6  ;;  %v2991_v21 = vld [vmem:[%s3303_s2] ss:$0 sm:$0xff]  ;;  %s2132_s18 = sshll.u32 %s2802_s17, 4  ;;  %s2133_s18 = int_to_ptr.vmem [resolvable:$true] %s2132_s18 }
   0xa   :  { %2501 = vmatpush3.bf16.xpose.msk.msra.mxu0 %vm2861_vm1, %v2496_v30  ;;  %v29_v27 = vld [vmem:[%s3302_s1 + $0x18] sm:$0xff]  ;;  %vm2621_vm12 = vmpackc.low %vm2029_vm11, %vm2029_vm11  ;;  %p2770_p1 = scmp.lt.s32.totalorder %s2133_s18, %s2133_s18 }
   0xb   :  { %2504 = vmatprep.subr.msk.bf16.mxu0 %vm2861_vm1, %v2502_v34  ;;  %v57_v6 = vld [vmem:[%s3305_s4 + $0x18] sm:$0xff] }
   0xf   :  { %2519 = vmatpush3.bf16.xpose.msk.msra.mxu1 %vm2861_vm1, %v2514_v20 }
  0x10   :  { %2522 = vmatprep.subr.msk.bf16.mxu1 %vm2861_vm1, %v2520_v23 }
  0x12   :  { %2507 = vmatpush3.bf16.xpose.msk.msra.mxu0 %vm2861_vm1, %v2502_v34 }
  0x13   :  { %2532 = vmatprep.subr.bf16.mxu0 %v2789_v35 }
  0x17   :  { %2525 = vmatpush3.bf16.xpose.msk.msra.mxu1 %vm2861_vm1, %v2520_v23 }
  0x18   :  { %2528 = vmatprep.subr.msk.bf16.mxu1 %vm2861_vm1, %v2526_v26 }
  0x1f   :  { %2531 = vmatpush3.bf16.xpose.msk.msra.mxu1 %vm2861_vm1, %v2526_v26  ;;  %v28_v26 = vld [vmem:[%s3302_s1 + $0x10] sm:$0xff]  ;;  %s2796_s1 = smov 88  }
  0x20   :  { %2546 = vmatprep.subr.bf16.mxu1 %v2789_v35 }
  0x26   :  { %2338 = vmatmul.mubr.msk.f32.vlgmr.msra.gmra.mrb[0].mxu1 %vm67_vm0, %v27_v33 }
  0x27   :  { %2340 = vmatprep.mubr.msk.f32.mxu1 %vm67_vm0, %v28_v26 }
  0x2a   :  { %2341 = vmatmul.mubr.msk.f32.gmra.mrb[2].mxu1 %vm67_vm0, %v29_v27 }
  0x90   :  { %v70_v8 = vpop.xlane.xlu0 %69 }
  0x91   :  { %v75_v9 = vmul.f32 0.03125, %v70_v8 }
  0x93   :  { %v2870_v10 = vsub.f32 %v2842_v0, %v75_v9  ;;  %v2793_v9 = vmov 0.0  }
  0x94   :  { %v73_v11 = vpop.xlane.xlu0 %72  ;;  %2375 = vmatprep.mubr.msk.f32.mxu1 %vm2792_vm8, %v2793_v9 }
  0x95   :  { %v76_v12 = vmul.f32 0.03125, %v73_v11  ;;  %v79_v13 = vmul.f32 %v2870_v10, %v2870_v10  ;;  %v112_v53 = vmul.f32 %v2143_v52, %v2870_v10 }
  0x97   :  { %v2875_v14 = vsub.f32 %v2847_v1, %v76_v12  ;;  %v81_v15 = vsel %vm67_vm0, %v79_v13, 0.0 }
  0x98   :  { %82 = vadd.xlane.f32.xlu1 %v81_v15  ;;  %v2145_v15 = vld [vmem:[%s3306_s5 + $0x2] ss:$0 sm:$0xff] }
  0x99   :  { %v80_v16 = vmul.f32 %v2875_v14, %v2875_v14  ;;  %v113_v57 = vmul.f32 %v2143_v52, %v2875_v14 }
  0x9b   :  { %v84_v17 = vsel %vm67_vm0, %v80_v16, 0.0 }
  0x9c   :  { %85 = vadd.xlane.f32.xlu1 %v84_v17 }
  0xf9   :  { %v2339_v63 = vpop.f32.mrb[0].mxu1 }
  0xfa   :  { %v331_v2 = vadd.f32 %v2339_v63, %v2954_v62  ;;  %v325_v3 = vpop.f32.mrb[1].mxu1 }
  0xfb   :  { %v326_v4 = vadd.f32 %v2954_v62, %v325_v3 }
  0xfd   :  { %v2964_v7 = vpack.i.bf16 %v331_v2, %v326_v4  ;;  %v2533_v8 = vpack.c.bf16 %v331_v2, %v326_v4 }
  0xff   :  { %2653 = vrot.lane.b32.xlu1 %v2964_v7, %s2790_s9 }
 0x103   :  { %2658 = vrot.lane.b32.xlu1 %v2964_v7, %s2791_s10 }
 0x125   :  { %v83_v36 = vpop.xlane.xlu1 %82 }
 0x126   :  { %v88_v37 = vmul.f32 0.032258064, %v83_v36 }
 0x128   :  { %2717 = vrsqrt.f32 %v88_v37  ;;  %vm92_vm2 = vcmp.eq.f32.partialorder %v88_v37, inf  ;;  %v95_v42 = vand.u32 2147483648, %v88_v37  ;;  %vm94_vm3 = vcmp.eq.f32.partialorder %v88_v37, 0.0 }
 0x129   :  { %v86_v38 = vpop.xlane.xlu1 %85 }
 0x12a   :  { %v89_v39 = vmul.f32 0.032258064, %v86_v38 }
 0x12c   :  { %2719 = vrsqrt.f32 %v89_v39  ;;  %vm99_vm4 = vcmp.eq.f32.partialorder %v89_v39, inf  ;;  %v102_v48 = vand.u32 2147483648, %v89_v39  ;;  %vm101_vm5 = vcmp.eq.f32.partialorder %v89_v39, 0.0 }
 0x132   :  { %v2718_v40 = vpop.eup %2717 }
 0x133   :  { %v91_v41 = vmul.f32 %v2718_v40, %v88_v37 }
 0x135   :  { %v93_v43 = vsel %vm92_vm2, %v88_v37, %v91_v41 }
 0x136   :  { %v2720_v44 = vpop.eup %2719  ;;  %v96_v45 = vsel %vm94_vm3, %v95_v42, %v93_v43 }
 0x137   :  { %v98_v46 = vmul.f32 %v2720_v44, %v89_v39  ;;  %v104_v47 = vadd.f32 1e-06, %v96_v45 }
 0x139   :  { %v100_v49 = vsel %vm99_vm4, %v89_v39, %v98_v46  ;;  %2721 = vrcp.f32 %v104_v47  ;;  %v2342_v39 = vpop.f32.mrb[2].mxu1 }
 0x13a   :  { %v103_v50 = vsel %vm101_vm5, %v102_v48, %v100_v49  ;;  %v335_v40 = vpop.f32.mrb[3].mxu1 }
 0x13b   :  { %v105_v51 = vadd.f32 1e-06, %v103_v50 }
 0x13d   :  { %2723 = vrcp.f32 %v105_v51 }
 0x143   :  { %v2722_v54 = vpop.eup %2721 }
 0x144   :  { %v114_v56 = vmul.f32 %v2722_v54, %v112_v53 }
 0x146   :  { %v120_v58 = vadd.f32 %v2144_v55, %v114_v56 }
 0x147   :  { %v2724_v59 = vpop.eup %2723 }
 0x148   :  { %v115_v60 = vmul.f32 %v2724_v59, %v113_v57  ;;  %2318 = vmatprep.mubr.msk.f32.mxu0 %vm67_vm0, %v120_v58  ;;  %v3037_v58 = vadd.f32 %v2342_v39, %v2954_v62  ;;  %v3040_v59 = vadd.f32 %v2954_v62, %v335_v40 }
 0x14a   :  { %v121_v61 = vadd.f32 %v2144_v55, %v115_v60  ;;  %v3044_v60 = vpack.i.bf16 %v3037_v58, %v3040_v59 }
 0x14c   :  { %2319 = vmatmul.mubr.msk.f32.vlgmr.msra.gmra.mrb[0].mxu0 %vm67_vm0, %v121_v61  ;;  %v2561_v61 = vpack.c.bf16 %v3037_v58, %v3040_v59 }
 0x14d   :  { %2535 = vmatpush3.bf16.xpose.msk.msra.mxu0 %vm2960_vm7, %v2533_v8  ;;  %2347 = vmatprep.mubr.msk.f32.mxu0 %vm2792_vm8, %v2793_v9 }
 0x14e   :  { %2536 = vmatprep.subr.bf16.mxu0 %v2789_v35 }
 0x171   :  { %v2975_v10 = vpop.permute.xlu1 %2653 }
 0x172   :  { %v2656_v44 = vunpack.i.h.bf16 %v2975_v10  ;;  %v2655_v45 = vunpack.i.l.bf16 %v2975_v10 }
 0x174   :  { %v2540_v51 = vpack.c.bf16 %v2656_v44, %v2655_v45 }
 0x175   :  { %v2659_v11 = vpop.permute.xlu1 %2658 }
 0x176   :  { %v2661_v12 = vunpack.i.h.bf16 %v2659_v11  ;;  %v2660_v13 = vunpack.i.l.bf16 %v2659_v11 }
 0x178   :  { %v2547_v14 = vpack.c.bf16 %v2661_v12, %v2660_v13 }
 0x17a   :  { %2549 = vmatpush3.bf16.xpose.msk.msra.mxu1 %vm2960_vm7, %v2547_v14 }
 0x17b   :  { %2553 = vmatprep.subr.bf16.mxu1 %v2789_v35 }
 0x21f   :  { %v2320_v16 = vpop.f32.mrb[0].mxu0 }
 0x220   :  { %v2983_v17 = vadd.f32 %v2320_v16, %v2145_v15  ;;  %v210_v18 = vpop.f32.mrb[1].mxu0 }
 0x221   :  { %v211_v19 = vadd.f32 %v2145_v15, %v210_v18 }
 0x223   :  { %2348 = vmatmul.mubr.msk.f32.vlgmr.msra.gmra.mrb[2].mxu0 %vm345_vm6, %v211_v19 }
 0x224   :  { %2354 = vmatprep.mubr.msk.f32.mxu0 %vm2792_vm8, %v2793_v9 }
 0x2f6   :  { %v421_v20 = vpop.f32.mrb[2].mxu0 }
 0x2f7   :  { %v425_v22 = vmul.f32 0.35355338, %v421_v20  ;;  %v2349_v23 = vpop.f32.mrb[3].mxu0 }
 0x2f9   :  { %v430_v24 = vadd.f32 %v2991_v21, %v425_v22 }
 0x2fb   :  { %v432_v25 = vsel %vm431_vm9, %v430_v24, -inf }
 0x2fc   :  { %433 = vmax.xlane.f32.xlu0 %v432_v25 }
 0x312   :  { %2648 = vrot.lane.b32.xlu0 %v2964_v7, %s2794_s19 }
 0x316   :  { %696 = vrot.lane.b32.xlu0 %v211_v19, %s2791_s10 }
 0x31a   :  { %870 = vrot.lane.b32.xlu0 %v211_v19, %s2795_s20 }
 0x389   :  { %v434_v28 = vpop.xlane.xlu0 %433 }
 0x38a   :  { %v435_v29 = vsub.f32 %v430_v24, %v434_v28 }
 0x38c   :  { %v436_v30 = vmul.f32 1.442695, %v435_v29 }
 0x38d   :  { %v2649_v31 = vpop.permute.xlu0 %2648 }
 0x38e   :  { %2725 = vpow2.f32 %v436_v30  ;;  %v2651_v32 = vunpack.i.h.bf16 %v2649_v31  ;;  %v2650_v33 = vunpack.i.l.bf16 %v2649_v31 }
 0x390   :  { %v2537_v34 = vpack.c.bf16 %v2651_v32, %v2650_v33 }
 0x391   :  { %v697_v36 = vpop.permute.xlu0 %696 }
 0x392   :  { %2538 = vmatpush3.bf16.msra.mxu0 %v2537_v34  ;;  %2376 = vmatmul.mubr.msk.f32.vlgmr.msra.gmra.mrb[4].mxu1 %vm345_vm6, %v697_v36 }
 0x393   :  { %2539 = vmatprep.subr.bf16.mxu0 %v2789_v35  ;;  %2389 = vmatprep.mubr.msk.f32.mxu1 %vm2792_vm8, %v2793_v9 }
 0x395   :  { %v871_v52 = vpop.permute.xlu0 %870 }
 0x398   :  { %v2726_v37 = vpop.eup %2725 }
 0x399   :  { %v438_v38 = vsel %vm431_vm9, %v2726_v37, 0.0 }
 0x39a   :  { %439 = vadd.xlane.f32.xlu1 %v438_v38 }
 0x3ab   :  { %522 = vrot.lane.b32.xlu1 %v211_v19, %s2790_s9 }
 0x3af   :  { %2663 = vrot.lane.b32.xlu1 %v2964_v7, %s2795_s20 }
 0x427   :  { %v440_v41 = vpop.xlane.xlu1 %439 }
 0x428   :  { %2727 = vrcp.f32 %v440_v41 }
 0x42b   :  { %v523_v42 = vpop.permute.xlu1 %522 }
 0x42f   :  { %v2664_v43 = vpop.permute.xlu1 %2663 }
 0x430   :  { %v2666_v46 = vunpack.i.h.bf16 %v2664_v43  ;;  %v2665_v47 = vunpack.i.l.bf16 %v2664_v43 }
 0x432   :  { %v2728_v48 = vpop.eup %2727  ;;  %v2554_v49 = vpack.c.bf16 %v2666_v46, %v2665_v47 }
 0x433   :  { %v442_v50 = vmul.f32 %v2728_v48, %v2726_v37 }
 0x434   :  { %2556 = vmatpush3.bf16.xpose.msk.msra.mxu1 %vm2960_vm7, %v2554_v49 }
 0x435   :  { %2355 = vmatmul.mubr.msk.f32.vlgmr.msra.gmra.mrb[4].mxu0 %vm431_vm9, %v442_v50  ;;  %2567 = vmatprep.subr.bf16.mxu1 %v2789_v35 }
 0x436   :  { %2542 = vmatpush3.bf16.xpose.msk.msra.mxu0 %vm2960_vm7, %v2540_v51  ;;  %2361 = vmatprep.mubr.msk.f32.mxu0 %vm2792_vm8, %v2793_v9 }
 0x437   :  { %2543 = vmatprep.subr.bf16.mxu0 %v2789_v35 }
 0x43b   :  { %2390 = vmatmul.mubr.msk.f32.vlgmr.msra.gmra.mrb[6].mxu1 %vm345_vm6, %v871_v52 }
 0x43c   :  { %2417 = vmatprep.mubr.msk.f32.mxu1 %vm2792_vm8, %v2793_v9 }
 0x43d   :  { %2362 = vmatmul.mubr.msk.f32.vlgmr.msra.gmra.mrb[6].mxu0 %vm345_vm6, %v523_v42 }
 0x43e   :  { %2368 = vmatprep.mubr.msk.f32.mxu0 %vm2792_vm8, %v2793_v9 }
 0x465   :  { %v774_v53 = vpop.f32.mrb[4].mxu1 }
 0x466   :  { %v778_v54 = vmul.f32 0.35355338, %v774_v53  ;;  %v2377_v55 = vpop.f32.mrb[5].mxu1 }
 0x468   :  { %v779_v56 = vadd.f32 %v2991_v21, %v778_v54 }
 0x46a   :  { %v780_v57 = vsel %vm431_vm9, %v779_v56, -inf }
 0x46b   :  { %781 = vmax.xlane.f32.xlu0 %v780_v57 }
 0x4f8   :  { %v782_v63 = vpop.xlane.xlu0 %781 }
 0x4f9   :  { %v783_v2 = vsub.f32 %v779_v56, %v782_v63 }
 0x4fb   :  { %v784_v3 = vmul.f32 1.442695, %v783_v2  ;;  %v3098_v2 = vld [vmem:[%s3303_s2 + $0x1] ss:$0 sm:$0xff]  ;;  %s2799_s2 = smov 8  }
 0x4fd   :  { %2729 = vpow2.f32 %v784_v3 }
 0x507   :  { %v2730_v20 = vpop.eup %2729 }
 0x508   :  { %v3048_v4 = vpop.f32.mrb[4].mxu0  ;;  %v786_v22 = vsel %vm431_vm9, %v2730_v20, 0.0 }
 0x509   :  { %v2356_v8 = vpop.f32.mrb[5].mxu0 }
 0x50e   :  { %v948_v10 = vpop.f32.mrb[6].mxu1 }
 0x50f   :  { %v952_v11 = vmul.f32 0.35355338, %v948_v10  ;;  %v2391_v12 = vpop.f32.mrb[7].mxu1 }
 0x510   :  { %v600_v13 = vpop.f32.mrb[6].mxu0 }
 0x511   :  { %v604_v62 = vmul.f32 0.35355338, %v600_v13  ;;  %v2363_v14 = vpop.f32.mrb[7].mxu0  ;;  %v953_v15 = vadd.f32 %v2991_v21, %v952_v11 }
 0x513   :  { %v954_v16 = vsel %vm431_vm9, %v953_v15, -inf  ;;  %v605_v18 = vadd.f32 %v2991_v21, %v604_v62 }
 0x514   :  { %955 = vmax.xlane.f32.xlu0 %v954_v16 }
 0x515   :  { %v606_v19 = vsel %vm431_vm9, %v605_v18, -inf }
 0x516   :  { %607 = vmax.xlane.f32.xlu1 %v606_v19 }
 0x51a   :  { %787 = vadd.xlane.f32.xlu1 %v786_v22 }
 0x52b   :  { %2668 = vrot.lane.b32.xlu1 %v2964_v7, %s2796_s1 }
 0x52f   :  { %2678 = vrot.lane.b32.xlu1 %v2964_v7, %s2797_s21 }
 0x533   :  { %2683 = vrot.lane.b32.xlu1 %v3044_v60, %s2790_s9 }
 0x537   :  { %1236 = vrot.lane.b32.xlu1 %v2983_v17, %s2790_s9 }
 0x5a1   :  { %v956_v21 = vpop.xlane.xlu0 %955 }
 0x5a2   :  { %v957_v23 = vsub.f32 %v953_v15, %v956_v21 }
 0x5a3   :  { %v608_v24 = vpop.xlane.xlu1 %607 }
 0x5a4   :  { %v958_v25 = vmul.f32 1.442695, %v957_v23  ;;  %v609_v26 = vsub.f32 %v605_v18, %v608_v24 }
 0x5a6   :  { %2731 = vpow2.f32 %v958_v25  ;;  %v610_v27 = vmul.f32 1.442695, %v609_v26 }
 0x5a7   :  { %v788_v28 = vpop.xlane.xlu1 %787 }
 0x5a8   :  { %2733 = vpow2.f32 %v610_v27 }
 0x5ab   :  { %v2669_v29 = vpop.permute.xlu1 %2668 }
 0x5ac   :  { %v2671_v30 = vunpack.i.h.bf16 %v2669_v29  ;;  %v2670_v31 = vunpack.i.l.bf16 %v2669_v29 }
 0x5ae   :  { %v2544_v32 = vpack.c.bf16 %v2671_v30, %v2670_v31 }
 0x5af   :  { %v2679_v33 = vpop.permute.xlu1 %2678 }
 0x5b0   :  { %v2732_v34 = vpop.eup %2731  ;;  %2545 = vmatpush3.bf16.msra.mxu0 %v2544_v32  ;;  %v2681_v52 = vunpack.i.h.bf16 %v2679_v33  ;;  %v2680_v53 = vunpack.i.l.bf16 %v2679_v33 }
 0x5b1   :  { %v960_v36 = vsel %vm431_vm9, %v2732_v34, 0.0  ;;  %2550 = vmatprep.subr.bf16.mxu0 %v2789_v35 }
 0x5b2   :  { %v2734_v37 = vpop.eup %2733  ;;  %961 = vadd.xlane.f32.xlu0 %v960_v36  ;;  %v2558_v56 = vpack.c.bf16 %v2681_v52, %v2680_v53 }
 0x5b3   :  { %v2684_v38 = vpop.permute.xlu1 %2683  ;;  %v612_v41 = vsel %vm431_vm9, %v2734_v37, 0.0 }
 0x5b4   :  { %v2686_v39 = vunpack.i.h.bf16 %v2684_v38  ;;  %v2685_v40 = vunpack.i.l.bf16 %v2684_v38 }
 0x5b6   :  { %v2568_v42 = vpack.c.bf16 %v2686_v39, %v2685_v40  ;;  %613 = vadd.xlane.f32.xlu0 %v612_v41 }
 0x5b7   :  { %v1237_v43 = vpop.permute.xlu1 %1236 }
 0x5b8   :  { %2570 = vmatpush3.bf16.xpose.msk.msra.mxu1 %vm2960_vm7, %v2568_v42 }
 0x5b9   :  { %2578 = vmatprep.subr.bf16.mxu1 %v2789_v35 }
 0x5bf   :  { %2418 = vmatmul.mubr.msk.f32.vlgmr.msra.gmra.mrb[8].mxu1 %vm345_vm6, %v1237_v43 }
 0x5c0   :  { %2438 = vmatprep.mubr.msk.f32.mxu1 %vm2792_vm8, %v2793_v9 }
 0x5cc   :  { %2673 = vrot.lane.b32.xlu0 %v2964_v7, %s2798_s22 }
 0x63f   :  { %v962_v44 = vpop.xlane.xlu0 %961 }
 0x643   :  { %v614_v45 = vpop.xlane.xlu0 %613 }
 0x644   :  { %2735 = vrcp.f32 %v614_v45 }
 0x645   :  { %2737 = vrcp.f32 %v788_v28 }
 0x646   :  { %2739 = vrcp.f32 %v962_v44 }
 0x647   :  { %v2674_v46 = vpop.permute.xlu0 %2673 }
 0x648   :  { %v2676_v47 = vunpack.i.h.bf16 %v2674_v46  ;;  %v2675_v48 = vunpack.i.l.bf16 %v2674_v46 }
 0x64a   :  { %v2551_v54 = vpack.c.bf16 %v2676_v47, %v2675_v48 }
 0x64e   :  { %v2736_v49 = vpop.eup %2735 }
 0x64f   :  { %v616_v50 = vmul.f32 %v2736_v49, %v2734_v37  ;;  %v2738_v51 = vpop.eup %2737 }
 0x650   :  { %v790_v7 = vmul.f32 %v2738_v51, %v2730_v20  ;;  %v2740_v55 = vpop.eup %2739 }
 0x651   :  { %2369 = vmatmul.mubr.msk.f32.vlgmr.msra.gmra.mrb[8].mxu0 %vm431_vm9, %v616_v50  ;;  %v964_v57 = vmul.f32 %v2740_v55, %v2732_v34 }
 0x652   :  { %2552 = vmatpush3.bf16.msra.mxu0 %v2551_v54  ;;  %2382 = vmatprep.mubr.msk.f32.mxu0 %vm2792_vm8, %v2793_v9 }
 0x653   :  { %2557 = vmatprep.subr.bf16.mxu0 %v2789_v35 }
 0x655   :  { %2383 = vmatmul.mubr.msk.f32.vlgmr.msra.gmra.mrb[10].mxu0 %vm431_vm9, %v790_v7 }
 0x656   :  { %2559 = vmatpush3.bf16.msra.mxu0 %v2558_v56  ;;  %2396 = vmatprep.mubr.msk.f32.mxu0 %vm2792_vm8, %v2793_v9 }
 0x657   :  { %2560 = vmatprep.subr.bf16.mxu0 %v2789_v35 }
 0x659   :  { %2397 = vmatmul.mubr.msk.f32.vlgmr.msra.gmra.mrb[12].mxu0 %vm431_vm9, %v964_v57 }
 0x65a   :  { %2403 = vmatprep.mubr.msk.f32.mxu0 %vm2792_vm8, %v2793_v9 }
 0x65f   :  { %2563 = vmatpush3.bf16.xpose.msk.msra.mxu0 %vm2960_vm7, %v2561_v61 }
 0x660   :  { %2564 = vmatprep.subr.bf16.mxu0 %v2789_v35 }
 0x666   :  { %2404 = vmatmul.mubr.msk.f32.vlgmr.msra.gmra.mrb[14].mxu0 %vm345_vm6, %v2983_v17 }
 0x667   :  { %2410 = vmatprep.mubr.msk.f32.mxu0 %vm2792_vm8, %v2793_v9 }
 0x692   :  { %v1314_v63 = vpop.f32.mrb[8].mxu1 }
 0x693   :  { %v1318_v3 = vmul.f32 0.35355338, %v1314_v63  ;;  %v2419_v8 = vpop.f32.mrb[9].mxu1 }
 0x695   :  { %v1319_v58 = vadd.f32 %v3098_v2, %v1318_v3 }
 0x697   :  { %v1320_v59 = vsel %vm431_vm9, %v1319_v58, -inf }
 0x698   :  { %1321 = vmax.xlane.f32.xlu1 %v1320_v59 }
 0x6a9   :  { %2693 = vrot.lane.b32.xlu1 %v3044_v60, %s2796_s1 }
 0x6ad   :  { %2698 = vrot.lane.b32.xlu1 %v3044_v60, %s2791_s10 }
 0x6b1   :  { %1410 = vrot.lane.b32.xlu1 %v2983_v17, %s2791_s10 }
 0x724   :  { %v3108_v61 = vpop.f32.mrb[8].mxu0 }
 0x725   :  { %v2370_v10 = vpop.f32.mrb[9].mxu0  ;;  %v1322_v13 = vpop.xlane.xlu1 %1321 }
 0x726   :  { %v1323_v14 = vsub.f32 %v1319_v58, %v1322_v13 }
 0x728   :  { %v3110_v11 = vpop.f32.mrb[10].mxu0  ;;  %v1324_v16 = vmul.f32 1.442695, %v1323_v14 }
 0x729   :  { %v2384_v12 = vpop.f32.mrb[11].mxu0  ;;  %v2694_v36 = vpop.permute.xlu1 %2693 }
 0x72a   :  { %2741 = vpow2.f32 %v1324_v16  ;;  %v2696_v38 = vunpack.i.h.bf16 %v2694_v36  ;;  %v2695_v39 = vunpack.i.l.bf16 %v2694_v36 }
 0x72c   :  { %v3112_v62 = vpop.f32.mrb[12].mxu0  ;;  %v2572_v43 = vpack.c.bf16 %v2696_v38, %v2695_v39 }
 0x72d   :  { %v2398_v15 = vpop.f32.mrb[13].mxu0  ;;  %v2699_v44 = vpop.permute.xlu1 %2698 }
 0x72e   :  { %v2701_v46 = vunpack.i.h.bf16 %v2699_v44  ;;  %v2700_v47 = vunpack.i.l.bf16 %v2699_v44  ;;  %v45_v44 = vld [vmem:[%s3304_s3 + $0x78] sm:$0xff] }
 0x730   :  { %v2575_v48 = vpack.c.bf16 %v2701_v46, %v2700_v47 }
 0x731   :  { %v1411_v49 = vpop.permute.xlu1 %1410 }
 0x734   :  { %v2742_v23 = vpop.eup %2741 }
 0x735   :  { %v1326_v24 = vsel %vm431_vm9, %v2742_v23, 0.0 }
 0x739   :  { %v1136_v18 = vpop.f32.mrb[14].mxu0 }
 0x73a   :  { %v1140_v19 = vmul.f32 0.35355338, %v1136_v18  ;;  %v2405_v20 = vpop.f32.mrb[15].mxu0 }
 0x73c   :  { %v1145_v22 = vadd.f32 %v3098_v2, %v1140_v19 }
 0x73e   :  { %v1146_v21 = vsel %vm431_vm9, %v1145_v22, -inf }
 0x73f   :  { %1147 = vmax.xlane.f32.xlu0 %v1146_v21 }
 0x743   :  { %1327 = vadd.xlane.f32.xlu0 %v1326_v24 }
 0x7cc   :  { %v1148_v25 = vpop.xlane.xlu0 %1147 }
 0x7cd   :  { %v1149_v26 = vsub.f32 %v1145_v22, %v1148_v25 }
 0x7cf   :  { %v1150_v27 = vmul.f32 1.442695, %v1149_v26 }
 0x7d0   :  { %v1328_v30 = vpop.xlane.xlu0 %1327 }
 0x7d1   :  { %2743 = vpow2.f32 %v1150_v27 }
 0x7db   :  { %v2744_v28 = vpop.eup %2743 }
 0x7dc   :  { %v1152_v29 = vsel %vm431_vm9, %v2744_v28, 0.0 }
 0x7dd   :  { %1153 = vadd.xlane.f32.xlu0 %v1152_v29 }
 0x7f3   :  { %2688 = vrot.lane.b32.xlu0 %v3044_v60, %s2794_s19 }
 0x86a   :  { %v1154_v31 = vpop.xlane.xlu0 %1153 }
 0x86b   :  { %2745 = vrcp.f32 %v1154_v31 }
 0x86c   :  { %2747 = vrcp.f32 %v1328_v30 }
 0x86e   :  { %v2689_v32 = vpop.permute.xlu0 %2688 }
 0x86f   :  { %v2691_v33 = vunpack.i.h.bf16 %v2689_v32  ;;  %v2690_v34 = vunpack.i.l.bf16 %v2689_v32 }
 0x871   :  { %v2565_v37 = vpack.c.bf16 %v2691_v33, %v2690_v34 }
 0x873   :  { %2566 = vmatpush3.bf16.msra.mxu0 %v2565_v37 }
 0x874   :  { %2571 = vmatprep.subr.bf16.mxu0 %v2789_v35 }
 0x875   :  { %v2746_v40 = vpop.eup %2745 }
 0x876   :  { %v1156_v41 = vmul.f32 %v2746_v40, %v2744_v28  ;;  %v2748_v42 = vpop.eup %2747 }
 0x877   :  { %v1330_v45 = vmul.f32 %v2748_v42, %v2742_v23  ;;  %v43_v42 = vld [vmem:[%s3304_s3 + $0x68] sm:$0xff] }
 0x878   :  { %2411 = vmatmul.mubr.msk.f32.vlgmr.msra.gmra.mrb[16].mxu0 %vm431_vm9, %v1156_v41  ;;  %v42_v41 = vld [vmem:[%s3304_s3 + $0x60] sm:$0xff] }
 0x879   :  { %2573 = vmatpush3.bf16.msra.mxu0 %v2572_v43  ;;  %2424 = vmatprep.mubr.msk.f32.mxu0 %vm2792_vm8, %v2793_v9  ;;  %v2588_v43 = vpack.c.bf16 %v43_v42, %v42_v41 }
 0x87a   :  { %2574 = vmatprep.subr.bf16.mxu0 %v2789_v35 }
 0x87c   :  { %2425 = vmatmul.mubr.msk.f32.vlgmr.msra.gmra.mrb[18].mxu0 %vm431_vm9, %v1330_v45 }
 0x87d   :  { %2431 = vmatprep.mubr.msk.f32.mxu0 %vm2792_vm8, %v2793_v9 }
 0x882   :  { %2577 = vmatpush3.bf16.xpose.msk.msra.mxu0 %vm2960_vm7, %v2575_v48 }
 0x883   :  { %2585 = vmatprep.subr.bf16.mxu0 %v2789_v35 }
 0x889   :  { %2432 = vmatmul.mubr.msk.f32.vlgmr.msra.gmra.mrb[20].mxu0 %vm345_vm6, %v1411_v49 }
 0x88a   :  { %2452 = vmatprep.mubr.msk.f32.mxu0 %vm2792_vm8, %v2793_v9 }
 0x94b   :  { %v3134_v50 = vpop.f32.mrb[16].mxu0 }
 0x94c   :  { %v2412_v51 = vpop.f32.mrb[17].mxu0 }
 0x94f   :  { %v1406_v52 = vpop.f32.mrb[18].mxu0 }
 0x950   :  { %v2426_v53 = vpop.f32.mrb[19].mxu0 }
 0x95c   :  { %v1488_v54 = vpop.f32.mrb[20].mxu0 }
 0x95d   :  { %v1492_v7 = vmul.f32 0.35355338, %v1488_v54  ;;  %v2433_v55 = vpop.f32.mrb[21].mxu0 }
 0x95f   :  { %v1493_v56 = vadd.f32 %v3098_v2, %v1492_v7  ;;  %v2201_v7 = vld [vmem:[%s3306_s5 + $0x3] ss:$0 sm:$0xff] }
 0x961   :  { %v1494_v57 = vsel %vm431_vm9, %v1493_v56, -inf }
 0x962   :  { %1495 = vmax.xlane.f32.xlu0 %v1494_v57 }
 0x978   :  { %2703 = vrot.lane.b32.xlu0 %v3044_v60, %s2798_s22 }
 0x97c   :  { %1584 = vrot.lane.b32.xlu0 %v2983_v17, %s2795_s20 }
 0x9ef   :  { %v1496_v63 = vpop.xlane.xlu0 %1495 }
 0x9f0   :  { %v1497_v3 = vsub.f32 %v1493_v56, %v1496_v63 }
 0x9f2   :  { %v1498_v8 = vmul.f32 1.442695, %v1497_v3 }
 0x9f3   :  { %v2704_v58 = vpop.permute.xlu0 %2703 }
 0x9f4   :  { %2749 = vpow2.f32 %v1498_v8  ;;  %v2706_v59 = vunpack.i.h.bf16 %v2704_v58  ;;  %v2705_v10 = vunpack.i.l.bf16 %v2704_v58 }
 0x9f6   :  { %v2579_v12 = vpack.c.bf16 %v2706_v59, %v2705_v10 }
 0x9f8   :  { %2580 = vmatpush3.bf16.msra.mxu1 %v2579_v12 }
 0x9f9   :  { %2581 = vmatprep.subr.bf16.mxu1 %v2789_v35  ;;  %v1585_v35 = vpop.permute.xlu0 %1584 }
 0x9fe   :  { %v2750_v13 = vpop.eup %2749 }
 0x9ff   :  { %v1500_v14 = vsel %vm431_vm9, %v2750_v13, 0.0 }
 0xa00   :  { %1501 = vadd.xlane.f32.xlu1 %v1500_v14 }
 0xa11   :  { %2708 = vrot.lane.b32.xlu1 %v3044_v60, %s2795_s20 }
 0xa8d   :  { %v1502_v15 = vpop.xlane.xlu1 %1501 }
 0xa8e   :  { %2751 = vrcp.f32 %v1502_v15 }
 0xa91   :  { %v2709_v17 = vpop.permute.xlu1 %2708 }
 0xa92   :  { %v2711_v16 = vunpack.i.h.bf16 %v2709_v17  ;;  %v2710_v18 = vunpack.i.l.bf16 %v2709_v17 }
 0xa94   :  { %v2582_v22 = vpack.c.bf16 %v2711_v16, %v2710_v18  ;;  %v46_v18 = vld [vmem:[%s3304_s3 + $0x80] sm:$0xff] }
 0xa98   :  { %v2752_v19 = vpop.eup %2751 }
 0xa99   :  { %v1504_v20 = vmul.f32 %v2752_v19, %v2750_v13  ;;  %v47_v19 = vld [vmem:[%s3304_s3 + $0x88] sm:$0xff] }
 0xa9b   :  { %2439 = vmatmul.mubr.msk.f32.vlgmr.msra.gmra.mrb[10].mxu1 %vm431_vm9, %v1504_v20  ;;  %v2596_v20 = vpack.c.bf16 %v47_v19, %v46_v18 }
 0xa9c   :  { %2584 = vmatpush3.bf16.xpose.msk.msra.mxu1 %vm2960_vm7, %v2582_v22  ;;  %2445 = vmatprep.mubr.msk.f32.mxu1 %vm2792_vm8, %v2793_v9  ;;  %v48_v22 = vld [vmem:[%s3304_s3 + $0x90] sm:$0xff] }
 0xa9d   :  { %2598 = vmatprep.subr.msk.bf16.mxu1 %vm2861_vm1, %v2596_v20 }
 0xaa3   :  { %2446 = vmatmul.mubr.msk.f32.vlgmr.msra.gmra.mrb[12].mxu1 %vm345_vm6, %v1585_v35  ;;  %v49_v35 = vld [vmem:[%s3304_s3 + $0x98] sm:$0xff] }
 0xaa4   :  { %2601 = vmatpush3.bf16.xpose.msk.msra.mxu1 %vm2861_vm1, %v2596_v20 }
 0xb6e   :  { %v1580_v21 = vpop.f32.mrb[10].mxu1 }
 0xb6f   :  { %v2440_v23 = vpop.f32.mrb[11].mxu1 }
 0xb70   :  { %v50_v23 = vld [vmem:[%s3304_s3 + $0xa0] sm:$0xff] }
 0xb76   :  { %v1662_v24 = vpop.f32.mrb[12].mxu1 }
 0xb77   :  { %v1666_v25 = vmul.f32 0.35355338, %v1662_v24  ;;  %v2447_v26 = vpop.f32.mrb[13].mxu1  ;;  %v51_v24 = vld [vmem:[%s3304_s3 + $0xa8] sm:$0xff] }
 0xb78   :  { %v52_v26 = vld [vmem:[%s3304_s3 + $0xb0] sm:$0xff] }
 0xb79   :  { %v1667_v27 = vadd.f32 %v3098_v2, %v1666_v25  ;;  %v2608_v25 = vpack.c.bf16 %v51_v24, %v50_v23 }
 0xb7b   :  { %v1668_v28 = vsel %vm431_vm9, %v1667_v27, -inf }
 0xb7c   :  { %1669 = vmax.xlane.f32.xlu1 %v1668_v28 }
 0xb8d   :  { %1045 = vrot.lane.b32.xlu1 %v3108_v61, %s2799_s2 }
 0xb91   :  { %1049 = vrot.lane.b32.xlu1 %v3110_v11, %s2800_s25 }
 0xb95   :  { %1053 = vrot.lane.b32.xlu1 %v3112_v62, %s2801_s26 }
 0xc09   :  { %v1670_v5 = vpop.xlane.xlu1 %1669 }
 0xc0a   :  { %v1671_v9 = vsub.f32 %v1667_v27, %v1670_v5  ;;  %v53_v27 = vld [vmem:[%s3304_s3 + $0xb8] sm:$0xff]  ;;  %v54_v5 = vld [vmem:[%s3305_s4] sm:$0xff] }
 0xc0b   :  { %v2614_v28 = vpack.c.bf16 %v53_v27, %v52_v26 }
 0xc0c   :  { %v1672_v29 = vmul.f32 1.442695, %v1671_v9  ;;  %v55_v9 = vld [vmem:[%s3305_s4 + $0x8] sm:$0xff] }
 0xc0d   :  { %v1046_v61 = vpop.permute.xlu1 %1045 }
 0xc0e   :  { %2753 = vpow2.f32 %v1672_v29  ;;  %v1056_v38 = vsel %vm345_vm6, %v3048_v4, %v1046_v61  ;;  %v44_v4 = vld [vmem:[%s3304_s3 + $0x70] sm:$0xff] }
 0xc0f   :  { %v2592_v45 = vpack.c.bf16 %v45_v44, %v44_v4  ;;  %v56_v29 = vld [vmem:[%s3305_s4 + $0x10] sm:$0xff] }
 0xc11   :  { %v1050_v32 = vpop.permute.xlu1 %1049 }
 0xc15   :  { %v1054_v37 = vpop.permute.xlu1 %1053 }
 0xc18   :  { %v2754_v30 = vpop.eup %2753 }
 0xc19   :  { %v1674_v2 = vsel %vm431_vm9, %v2754_v30, 0.0 }
 0xc1a   :  { %1675 = vadd.xlane.f32.xlu0 %v1674_v2  ;;  %v2626_v2 = vpack.c.bf16 %v57_v6, %v56_v29 }
 0xc30   :  { %2713 = vrot.lane.b32.xlu0 %v3044_v60, %s2797_s21  ;;  %v1057_v60 = vsel %vm431_vm9, %v1056_v38, %v1050_v32 }
 0xc31   :  { %v1059_v40 = vsel %vm1058_vm10, %v1057_v60, %v1054_v37 }
 0xc34   :  { %1759 = vrot.lane.b32.xlu0 %v1406_v52, %s2799_s2 }
 0xc38   :  { %1763 = vrot.lane.b32.xlu0 %v1580_v21, %s2800_s25  ;;  %v2602_v21 = vpack.c.bf16 %v49_v35, %v48_v22 }
 0xc3a   :  { %2604 = vmatprep.subr.msk.bf16.mxu1 %vm2861_vm1, %v2602_v21 }
 0xc3b   :  { %2607 = vmatpush3.bf16.xpose.msk.msra.mxu1 %vm2861_vm1, %v2602_v21 }
 0xc3c   :  { %2610 = vmatprep.subr.msk.bf16.mxu1 %vm2861_vm1, %v2608_v25 }
 0xc43   :  { %2613 = vmatpush3.bf16.xpose.msk.msra.mxu1 %vm2861_vm1, %v2608_v25 }
 0xc44   :  { %2616 = vmatprep.subr.msk.bf16.mxu1 %vm2861_vm1, %v2614_v28 }
 0xc4b   :  { %2619 = vmatpush3.bf16.xpose.msk.msra.mxu1 %vm2861_vm1, %v2614_v28 }
 0xca7   :  { %v1676_v11 = vpop.xlane.xlu0 %1675 }
 0xca8   :  { %2755 = vrcp.f32 %v1676_v11 }
 0xcab   :  { %v2714_v31 = vpop.permute.xlu0 %2713 }
 0xcac   :  { %v2716_v62 = vunpack.i.h.bf16 %v2714_v31  ;;  %v2715_v33 = vunpack.i.l.bf16 %v2714_v31 }
 0xcae   :  { %v2586_v34 = vpack.c.bf16 %v2716_v62, %v2715_v33 }
 0xcaf   :  { %v1760_v48 = vpop.permute.xlu0 %1759 }
 0xcb0   :  { %2587 = vmatpush3.bf16.msra.mxu0 %v2586_v34  ;;  %v1770_v51 = vsel %vm345_vm6, %v3134_v50, %v1760_v48 }
 0xcb1   :  { %2589 = vmatprep.subr.bf16.mxu0 %v2588_v43 }
 0xcb2   :  { %v2756_v36 = vpop.eup %2755 }
 0xcb3   :  { %v1678_v39 = vmul.f32 %v2756_v36, %v2754_v30  ;;  %v1764_v49 = vpop.permute.xlu0 %1763  ;;  %v2620_v30 = vpack.c.bf16 %v55_v9, %v54_v5 }
 0xcb4   :  { %v1771_v52 = vsel %vm431_vm9, %v1770_v51, %v1764_v49 }
 0xcb5   :  { %2453 = vmatmul.mubr.msk.f32.vlgmr.msra.gmra.mrb[22].mxu0 %vm431_vm9, %v1678_v39 }
 0xcb6   :  { %2463 = vmatprep.mubr.msk.f32.mxu0 %vm67_vm0, %v1059_v40  ;;  %2591 = vmatpush3.bf16.msra.mxu0 %v2588_v43  ;;  %v2202_v43 = vld [vmem:[%s3306_s5 + $0x4] ss:$0 sm:$0xff] }
 0xcb7   :  { %2593 = vmatprep.subr.bf16.mxu0 %v2592_v45 }
 0xcba   :  { %2595 = vmatpush3.bf16.msra.mxu0 %v2592_v45 }
 0xcbb   :  { %2622 = vmatprep.subr.msk.bf16.mxu0 %vm2621_vm12, %v2620_v30 }
 0xd88   :  { %v1754_v46 = vpop.f32.mrb[22].mxu0 }
 0xd89   :  { %1767 = vrot.lane.b32.xlu1 %v1754_v46, %s2801_s26  ;;  %v2454_v47 = vpop.f32.mrb[23].mxu0  ;;  %v2203_v46 = vld [vmem:[%s3306_s5 + $0x5] ss:$0 sm:$0xff] }
 0xdfb   :  { %v1768_v53 = vpop.permute.xlu1 %1767 }
 0xdfc   :  { %v1772_v54 = vsel %vm1058_vm10, %v1771_v52, %v1768_v53 }
 0xdfd   :  { %2464 = vmatmul.mubr.msk.f32.vlgmr.msra.gmra.mrb[24].mxu0 %vm67_vm0, %v1772_v54  ;;  %v2204_v54 = vld [vmem:[%s3305_s4 + $0x20] ss:$0 sm:$0xff]  ;;  %s2765_s4 = scalar_lea.vmem %s2133_s18, 256 }
 0xdfe   :  { %2625 = vmatpush3.bf16.xpose.msk.msra.mxu0 %vm2621_vm12, %v2620_v30  ;;  %p2766_p0 = scmp.ne.s32.totalorder %s2133_s18, %s2765_s4  ;;  %p2771_p2 = scmp.lt.s32.totalorder %s2765_s4, %s2765_s4 }
 0xdff   :  { %2628 = vmatprep.subr.msk.bf16.mxu0 %vm2621_vm12, %v2626_v2 }
 0xe00   :  { %p2772_p3 = por %p2771_p2, %p2770_p1 }
 0xe02   :  { %p2773_p4 = pnand %p2772_p3, %p2766_p0 }
 0xe06   :  { %2631 = vmatpush3.bf16.xpose.msk.msra.mxu0 %vm2621_vm12, %v2626_v2 }
 0xed0   :  { %v2465_v55 = vpop.f32.mrb[24].mxu0 }
 0xed1   :  { %v1855_v56 = vadd.f32 %v2465_v55, %v2847_v1  ;;  %v1845_v57 = vpop.f32.mrb[25].mxu0 }
 0xed2   :  { %v1854_v63 = vadd.f32 %v1845_v57, %v2842_v0 }
 0xed3   :  { %v3192_v3 = vadd.f32 %v2201_v7, %v1855_v56 }
 0xed4   :  { %v3194_v50 = vadd.f32 %v2201_v7, %v1854_v63 }
 0xed5   :  { %v1865_v8 = vsel %vm67_vm0, %v3192_v3, 0.0 }
 0xed6   :  { %1866 = vadd.xlane.f32.xlu1 %v1865_v8  ;;  %v1862_v58 = vsel %vm67_vm0, %v3194_v50, 0.0 }
 0xed7   :  { %1863 = vadd.xlane.f32.xlu0 %v1862_v58  ;;  %v2215_v58 = vld [vmem:[%s3306_s5 + $0x6] ss:$0 sm:$0xff] }
 0xf63   :  { %v1867_v59 = vpop.xlane.xlu1 %1866 }
 0xf64   :  { %v1869_v10 = vmul.f32 0.03125, %v1867_v59  ;;  %v1864_v12 = vpop.xlane.xlu0 %1863 }
 0xf65   :  { %v1868_v13 = vmul.f32 0.03125, %v1864_v12 }
 0xf66   :  { %v3201_v1 = vsub.f32 %v3192_v3, %v1869_v10 }
 0xf67   :  { %v3204_v0 = vsub.f32 %v3194_v50, %v1868_v13 }
 0xf68   :  { %v1873_v17 = vmul.f32 %v3201_v1, %v3201_v1  ;;  %v1905_v48 = vmul.f32 %v2202_v43, %v3201_v1 }
 0xf69   :  { %v1872_v14 = vmul.f32 %v3204_v0, %v3204_v0  ;;  %v1904_v44 = vmul.f32 %v2202_v43, %v3204_v0 }
 0xf6a   :  { %v1877_v16 = vsel %vm67_vm0, %v1873_v17, 0.0 }
 0xf6b   :  { %v1874_v15 = vsel %vm67_vm0, %v1872_v14, 0.0 }
 0xf6c   :  { %1875 = vadd.xlane.f32.xlu0 %v1874_v15 }
 0xf70   :  { %1878 = vadd.xlane.f32.xlu0 %v1877_v16 }
 0xff9   :  { %v1876_v61 = vpop.xlane.xlu0 %1875 }
 0xffa   :  { %v1880_v11 = vmul.f32 0.032258064, %v1876_v61 }
 0xffc   :  { %2757 = vrsqrt.f32 %v1880_v11  ;;  %vm1884_vm13 = vcmp.eq.f32.partialorder %v1880_v11, inf  ;;  %v1887_v34 = vand.u32 2147483648, %v1880_v11  ;;  %vm1886_vm14 = vcmp.eq.f32.partialorder %v1880_v11, 0.0 }
 0xffd   :  { %v1879_v31 = vpop.xlane.xlu0 %1878 }
 0xffe   :  { %v1881_v32 = vmul.f32 0.032258064, %v1879_v31 }
0x1000   :  { %2759 = vrsqrt.f32 %v1881_v32  ;;  %vm1891_vm15 = vcmp.eq.f32.partialorder %v1881_v32, inf  ;;  %v1894_v40 = vand.u32 2147483648, %v1881_v32  ;;  %vm1893_vm1 = vcmp.eq.f32.partialorder %v1881_v32, 0.0 }
0x1006   :  { %v2758_v62 = vpop.eup %2757 }
0x1007   :  { %v1883_v33 = vmul.f32 %v2758_v62, %v1880_v11 }
0x1009   :  { %v1885_v36 = vsel %vm1884_vm13, %v1880_v11, %v1883_v33 }
0x100a   :  { %v2760_v37 = vpop.eup %2759  ;;  %v1888_v38 = vsel %vm1886_vm14, %v1887_v34, %v1885_v36 }
0x100b   :  { %v1890_v39 = vmul.f32 %v2760_v37, %v1881_v32  ;;  %v1896_v60 = vadd.f32 1e-06, %v1888_v38 }
0x100d   :  { %v1892_v41 = vsel %vm1891_vm15, %v1881_v32, %v1890_v39  ;;  %2761 = vrcp.f32 %v1896_v60 }
0x100e   :  { %v1895_v42 = vsel %vm1893_vm1, %v1894_v40, %v1892_v41 }
0x100f   :  { %v1897_v4 = vadd.f32 1e-06, %v1895_v42 }
0x1011   :  { %2763 = vrcp.f32 %v1897_v4 }
0x1017   :  { %v2762_v45 = vpop.eup %2761 }
0x1018   :  { %v1906_v47 = vmul.f32 %v2762_v45, %v1904_v44 }
0x101a   :  { %v1912_v49 = vadd.f32 %v2203_v46, %v1906_v47 }
0x101b   :  { %v2764_v51 = vpop.eup %2763 }
0x101c   :  { %v1907_v52 = vmul.f32 %v2764_v51, %v1905_v48  ;;  %2482 = vmatprep.mubr.msk.f32.mxu1 %vm67_vm0, %v1912_v49 }
0x101e   :  { %v1913_v53 = vadd.f32 %v2203_v46, %v1907_v52 }
0x1020   :  { %2483 = vmatmul.mubr.msk.f32.vlgmr.msra.gmra.mrb[14].mxu1 %vm67_vm0, %v1913_v53 }
0x10f3   :  { %v2484_v7 = vpop.f32.mrb[14].mxu1 }
0x10f4   :  { %v2020_v55 = vadd.f32 %v2484_v7, %v2204_v54  ;;  %v2014_v56 = vpop.f32.mrb[15].mxu1 }
0x10f5   :  { %v2015_v57 = vadd.f32 %v2204_v54, %v2014_v56 }
0x10f6   :  { %v2024_v8 = vmax.f32 %v2020_v55, 0.0 }
0x10f7   :  { %v2023_v63 = vmax.f32 %v2015_v57, 0.0 }
0x10f9   :  { %2493 = vmatprep.mubr.msk.f32.mxu0 %vm2029_vm11, %v2023_v63 }
0x10fa   :  { %2494 = vmatmul.mubr.msk.f32.vlgmr.msra.gmra.mrb[26].mxu0 %vm2029_vm11, %v2024_v8 }
0x11cd   :  { %v2495_v59 = vpop.f32.mrb[26].mxu0 }
0x11ce   :  { %v2120_v10 = vadd.f32 %v2495_v59, %v2215_v58  ;;  %v2114_v12 = vpop.f32.mrb[27].mxu0 }
0x11cf   :  { %v2115_v13 = vadd.f32 %v2215_v58, %v2114_v12 }
0x11d0   :  { %v2124_v1 = vadd.f32 %v2120_v10, %v3192_v3 }
0x11d1   :  { %v2123_v0 = vadd.f32 %v2115_v13, %v3194_v50 }
0x11d2   :  { %2126 = vst.msk [vmem:[#allocation2 + $0x8] sm:$0xff] %vm67_vm0, %v2124_v1 }
0x11d3   :  { %2125 = vst.msk [vmem:[#allocation2] sm:$0xff] %vm67_vm0, %v2123_v0 }
0x11d4   :  { %2776 = shalt.err (!%p2773_p4)
}
0x11d5   :  { %s2777_s20 = scalar_lea.hbm %s3307_s6, 256 }
0x11d6   :  { %p2778_p5 = scmp.ne.s32.totalorder %s3307_s6, %s2777_s20  ;;  %p2781_p6 = scmp.lt.u32.totalorder %s2777_s20, %s3307_s6 }
0x11d8   :  { %p2783_p7 = pnand %p2781_p6, %p2778_p5 }
0x11da   :  { %2786 = shalt.err (!%p2783_p7)
}
0x11db   :  { %s2803_s24 = smov 128  }
0x11dc   :  { %2138 = dma.vmem_to_hbm [thread:$0]  %s2133_s18, 256, %s3307_s6, [#allocation3], %s2803_s24, %s2803_s24, %s2799_s2  }
0x11dd   :  { %2787 = dma.done.wait [#allocation3], 256  }
0x11de   :  { %2788 = vsyncadd [#allocation3], 4294967040 }
0x11df   :  { %2142 = vsyncpa [#allocation3], 1 }

</bundles_post_ra>
